<compile_context>
chip_gen: v7x
topology: tpu7x:2x2x1
jax: 0.10.0
libtpu: 0.0.40
codegen_flags: <defaults>
</compile_context>

<pallas_src>
import functools

import jax
import jax.numpy as jnp
from jax import lax
from jax.experimental import pallas as pl
from jax.experimental.pallas import tpu as pltpu


NINNER = 2


# ----------------------------------------------------------------------------------
# Fused kernel: one grid step == `nb` images, everything stays on-chip.
# ----------------------------------------------------------------------------------
def _fused_expansion_kernel(xl_ref, xh_ref, u_ref, b0_ref, b1_ref, bias_ref,
                            o_ref, s0_ref, s1_ref,
                            *, nb, h_low, h2, row_off, wa, wh, wo):
    """Row-pair packed layout: a kernel row holds image rows (2i, 2i+1) in its lanes.

    upconv: one matmul (depth-to-space interleave is just U's column ordering).
    conv0/conv1: one matmul each; 3 consecutive packed rows cover the 4 image rows a
    packed output row needs, so K = 3*row_width and the output is lane-dense.
    """
    f32 = jnp.float32
    dot = functools.partial(jnp.dot, preferred_element_type=f32)
    hp = h2 + 2                      # packed rows per image incl. one zero pad row each side
    rtot = nb * hp                   # total staged rows
    wc0 = wa + wh                    # conv0 staged row width (upconv part | skip part)

    # --- ConvTranspose2d(k=2, s=2) + BN + ReLU: ONE matmul over the whole chunk --------
    up = jnp.maximum(dot(xl_ref[...], u_ref[...]) + bias_ref[0:1, 0:wa], 0.0)  # (nb*h_low, wa)
    hi = xh_ref[...]                                                           # (nb*h2, wh)

    # --- stage conv0 input (row crop + channel concat) into zero-padded packed scratch -
    zc0 = jnp.zeros((1, wc0), f32)
    for n in range(nb):                                    # static unroll, nb is small
        base = n * hp
        s0_ref[base:base + 1, :] = zc0
        s0_ref[base + hp - 1:base + hp, :] = zc0
        s0_ref[base + 1:base + 1 + h2, 0:wa] = (
            up[n * h_low + row_off:n * h_low + row_off + h2, :])
        s0_ref[base + 1:base + 1 + h2, wa:wc0] = hi[n * h2:(n + 1) * h2, :]

    # --- conv0 (3x3, pad 1) + BN + ReLU: ONE matmul, K = 3*(wa+wh) ----------------------
    x0 = jnp.concatenate(
        [s0_ref[0:rtot - 2, :], s0_ref[1:rtot - 1, :], s0_ref[2:rtot, :]], axis=-1)
    y0 = jnp.maximum(dot(x0, b0_ref[...]) + bias_ref[1:2, 0:wo], 0.0)          # (rtot-2, wo)

    # --- stage conv1 input (drops the 2 junk image-boundary rows per image) ------------
    zc1 = jnp.zeros((1, wo), f32)
    for n in range(nb):
        base = n * hp
        s1_ref[base:base + 1, :] = zc1
        s1_ref[base + hp - 1:base + hp, :] = zc1
        s1_ref[base + 1:base + 1 + h2, :] = y0[base:base + h2, :]

    # --- conv1 (3x3, pad 1) + BN + ReLU + lane-dense store: ONE matmul, K = 3*wo --------
    x1 = jnp.concatenate(
        [s1_ref[0:rtot - 2, :], s1_ref[1:rtot - 1, :], s1_ref[2:rtot, :]], axis=-1)
    y1 = jnp.maximum(dot(x1, b1_ref[...]) + bias_ref[2:3, 0:wo], 0.0)          # (rtot-2, wo)
    for n in range(nb):
        o_ref[n * h2:(n + 1) * h2, :] = y1[n * hp:n * hp + h2, :]


# ----------------------------------------------------------------------------------
# Parameter preparation (wrapper side, cheap).
# ----------------------------------------------------------------------------------
def _fuse_affine(bias, gamma, beta, mean, var, eps=1e-5):
    s = gamma / jnp.sqrt(var + eps)
    return s, bias * s + (beta - mean * s)


def _packed_upconv_mat(w_t, scale, w_low):
    """ConvTranspose2d(k=2,s=2) weight (Cin, Cout, 2, 2), BN scale folded in, as a single
    lane matrix (w_low*Cin, 2*(2*w_low)*Cout) producing row-pair packed output:
        col = d * (2*w_low*Cout) + w_out*Cout + co     (d = output image-row parity)."""
    cin, cout = w_t.shape[0], w_t.shape[1]
    blk = jnp.transpose(w_t, (2, 3, 0, 1)) * scale[None, None, None, :]     # (di, dj, Ci, Co)
    j = jnp.arange(w_low)[:, None]
    jj = jnp.arange(2 * w_low)[None, :]
    dj = jj - 2 * j
    valid = ((dj == 0) | (dj == 1)).astype(jnp.float32)[..., None, None]
    djc = jnp.clip(dj, 0, 1)
    parts = []
    for d in range(2):
        sel = blk[d][djc] * valid                                           # (wl, 2wl, Ci, Co)
        parts.append(jnp.transpose(sel, (0, 2, 1, 3)).reshape(w_low * cin, 2 * w_low * cout))
    return jnp.concatenate(parts, axis=1)


def _packed_conv_taps(w_c, scale, ci_lo, ci_hi, win, wout, crop_ow):
    """Conv2d(3x3, s=1, p=1) weight (Cout, Cin, 3, 3) restricted to input channels
    [ci_lo:ci_hi], as 3 window-tap matrices for the row-pair packed layout.

    Tap t multiplies packed input row (i + t - 1) when producing packed output row i:
        row = d_in*(win*Cin_sub) + w_in*Cin_sub + ci     (d_in = image-row parity)
        col = e_out*(wout*Cout)  + w_out*Cout  + co      (e_out = image-row parity)
        entry = w[co, ci_lo+ci, ky, kx] * scale[co], ky = 2*t + d_in - e_out - 1,
                kx = (w_in - crop_ow) - w_out + 1; zero when ky/kx leave [0,2] or the
                input column falls outside the cropped window.
    """
    cin = ci_hi - ci_lo
    cout = w_c.shape[0]
    wk = jnp.transpose(w_c[:, ci_lo:ci_hi], (2, 3, 1, 0)) * scale[None, None, None, :]  # (ky,kx,Ci,Co)
    w_i = jnp.arange(win)[:, None]
    w_o = jnp.arange(wout)[None, :]
    kx = (w_i - crop_ow) - w_o + 1
    col_ok = (w_i - crop_ow >= 0) & (w_i - crop_ow < wout)
    valid = ((kx >= 0) & (kx <= 2) & col_ok).astype(jnp.float32)[..., None, None]
    kxc = jnp.clip(kx, 0, 2)
    zero = jnp.zeros((win * cin, wout * cout), jnp.float32)
    taps = []
    for t in range(3):
        d_parts = []
        for d in range(2):
            e_parts = []
            for e in range(2):
                ky = 2 * t + d - e - 1
                if 0 <= ky <= 2:
                    sel = wk[ky][kxc] * valid                               # (win, wout, Ci, Co)
                    m = jnp.transpose(sel, (0, 2, 1, 3)).reshape(win * cin, wout * cout)
                else:
                    m = zero
                e_parts.append(m)
            d_parts.append(jnp.concatenate(e_parts, axis=1))               # (win*Ci, 2*wout*Co)
        taps.append(jnp.concatenate(d_parts, axis=0))                      # (2*win*Ci, 2*wout*Co)
    return taps


# ----------------------------------------------------------------------------------
# Forward (Pallas): I/O in NCHW, same semantics as UNetExpansionBlock.forward(low, high)
# ----------------------------------------------------------------------------------
def unet_expansion_block_forward(low_nchw, high_nchw, p, images_per_step=None):
    n, c_in, h_low, w_low = low_nchw.shape
    _, c_high, h_hi, w_hi = high_nchw.shape
    c_up = p["up_w"].shape[1]
    c_out = p["c0_w"].shape[0]
    w_up = 2 * w_low

    assert h_hi % 2 == 0, "row-pair packed layout needs an even output height"
    h2 = h_hi // 2
    crop_oh = (2 * h_low - h_hi) // 2
    crop_ow = (2 * w_low - w_hi) // 2
    # TODO(synk): an odd vertical crop offset would need a row re-pack; not exercised here.
    assert crop_oh % 2 == 0
    row_off = crop_oh // 2

    nb = n if images_per_step is None else images_per_step   # images per grid step
    assert n % nb == 0
    steps = n // nb

    wa = 2 * w_up * c_up          # packed upconv row width
    wh = 2 * w_hi * c_high        # packed skip row width
    wo = 2 * w_hi * c_out         # packed output row width (lane-dense multiple of 128)

    # NCHW -> row-pair packed 2-D slabs (free row-major reshapes after the NHWC transpose).
    x_low = jnp.transpose(low_nchw, (0, 2, 3, 1)).reshape(n * h_low, w_low * c_in)
    x_high = jnp.transpose(high_nchw, (0, 2, 3, 1)).reshape(n * h2, wh)

    # Fold conv bias + BatchNorm(eval) into per-channel (scale, shift); the scale goes
    # into every weight matrix, the shift is a per-lane bias row added in the epilogues.
    s_up, t_up = _fuse_affine(p["up_b"], p["up_gamma"], p["up_beta"], p["up_mean"], p["up_var"])
    s_c0, t_c0 = _fuse_affine(p["c0_b"], p["c0_gamma"], p["c0_beta"], p["c0_mean"], p["c0_var"])
    s_c1, t_c1 = _fuse_affine(p["c1_b"], p["c1_gamma"], p["c1_beta"], p["c1_mean"], p["c1_var"])

    u = _packed_upconv_mat(p["up_w"], s_up, w_low)                                  # (wl*Cin, wa)
    a_taps = _packed_conv_taps(p["c0_w"], s_c0, 0, c_up, w_up, w_hi, crop_ow)       # upconv chans
    h_taps = _packed_conv_taps(p["c0_w"], s_c0, c_up, c_up + c_high, w_hi, w_hi, 0)  # skip chans
    b0 = jnp.concatenate([jnp.concatenate([a_taps[t], h_taps[t]], axis=0)
                          for t in range(3)], axis=0)                               # (3*(wa+wh), wo)
    b1 = jnp.concatenate(_packed_conv_taps(p["c1_w"], s_c1, 0, c_out, w_hi, w_hi, 0),
                         axis=0)                                                    # (3*wo, wo)

    bw = max(wa, wo)
    bias_pack = jnp.stack([
        jnp.pad(jnp.tile(t_up, 2 * w_up), (0, bw - wa)),
        jnp.pad(jnp.tile(t_c0, 2 * w_hi), (0, bw - wo)),
        jnp.pad(jnp.tile(t_c1, 2 * w_hi), (0, bw - wo)),
    ], axis=0)                                                                      # (3, bw)

    kernel = functools.partial(
        _fused_expansion_kernel,
        nb=nb, h_low=h_low, h2=h2, row_off=row_off, wa=wa, wh=wh, wo=wo)

    m_conv = steps * (nb * (h2 + 2) - 2)
    flops = 2 * (n * h_low * (w_low * c_in) * wa
                 + m_conv * 3 * (wa + wh) * wo
                 + m_conv * 3 * wo * wo)
    bytes_acc = 4 * (x_low.size + x_high.size + n * h2 * wo
                     + u.size + 3 * (wa + wh) * wo + 3 * wo * wo + 3 * bw)

    out = pl.pallas_call(
        kernel,
        out_shape=jax.ShapeDtypeStruct((n * h2, wo), jnp.float32),
        grid_spec=pltpu.PrefetchScalarGridSpec(
            num_scalar_prefetch=0,
            grid=(steps,),
            in_specs=[
                pl.BlockSpec((nb * h_low, w_low * c_in), lambda b: (b, 0)),
                pl.BlockSpec((nb * h2, wh), lambda b: (b, 0)),
                # Grid-invariant weights: constant block index -> fetched once.  At real
                # U-Net widths (v7x, 64 MiB VMEM) these would get pl.Buffered(1) and a
                # width/Cin tiling plan; unnecessary at this size.
                pl.BlockSpec(u.shape, lambda b: (0, 0)),
                pl.BlockSpec(b0.shape, lambda b: (0, 0)),
                pl.BlockSpec(b1.shape, lambda b: (0, 0)),
                pl.BlockSpec(bias_pack.shape, lambda b: (0, 0)),
            ],
            out_specs=pl.BlockSpec((nb * h2, wo), lambda b: (b, 0)),
            scratch_shapes=[
                pltpu.VMEM((nb * (h2 + 2), wa + wh), jnp.float32),
                pltpu.VMEM((nb * (h2 + 2), wo), jnp.float32),
            ],
        ),
        compiler_params=pltpu.CompilerParams(dimension_semantics=("parallel",)),
        cost_estimate=pl.CostEstimate(flops=int(flops), transcendentals=0,
                                      bytes_accessed=int(bytes_acc)),
    )(x_low, x_high, u, b0, b1, bias_pack)

    # (N*H/2, 2*W*C) is row-major identical to (N, H, W*C): free reshape back to NCHW.
    return jnp.transpose(out.reshape(n, h_hi, w_hi, c_out), (0, 3, 1, 2))


# ----------------------------------------------------------------------------------
# Pure-JAX reference (independent path) for validation.
# ----------------------------------------------------------------------------------
def _bn_relu(x, gamma, beta, mean, var, eps=1e-5):
    y = (x - mean) / jnp.sqrt(var + eps) * gamma + beta
    return jnp.maximum(y, 0.0)


def _center_crop_nhwc(x, target_hw):
    h, w = x.shape[1:3]
    th, tw = target_hw
    oh, ow = (h - th) // 2, (w - tw) // 2
    return x[:, oh:oh + th, ow:ow + tw, :]


def reference_forward(low_nchw, high_nchw, p):
    low = jnp.transpose(low_nchw, (0, 2, 3, 1))
    high = jnp.transpose(high_nchw, (0, 2, 3, 1))
    # ConvTranspose2d(k=2, s=2)
    y = jnp.einsum("nhwc,cokl->nhkwlo", low, p["up_w"])
    n, hh, _, ww, _, co = y.shape
    y = y.reshape(n, 2 * hh, 2 * ww, co) + p["up_b"]
    y = _bn_relu(y, p["up_gamma"], p["up_beta"], p["up_mean"], p["up_var"])
    y = _center_crop_nhwc(y, high.shape[1:3])
    h = jnp.concatenate([y, high], axis=-1)
    for i in range(NINNER):
        w_hwio = jnp.transpose(p[f"c{i}_w"], (2, 3, 1, 0))
        h = lax.conv_general_dilated(h, w_hwio, (1, 1), "SAME",
                                     dimension_numbers=("NHWC", "HWIO", "NHWC")) + p[f"c{i}_b"]
        h = _bn_relu(h, p[f"c{i}_gamma"], p[f"c{i}_beta"], p[f"c{i}_mean"], p[f"c{i}_var"])
    return jnp.transpose(h, (0, 3, 1, 2))


# ----------------------------------------------------------------------------------
# Deterministic parameter construction + run
# ----------------------------------------------------------------------------------
def make_params(key, up_cin, up_cout, conv_cin, conv_cout):
    ks = iter(jax.random.split(key, 32))
    p = {}

    def bn(prefix, c):
        p[f"{prefix}_gamma"] = 1.0 + 0.1 * jax.random.normal(next(ks), (c,), jnp.float32)
        p[f"{prefix}_beta"] = 0.1 * jax.random.normal(next(ks), (c,), jnp.float32)
        p[f"{prefix}_mean"] = 0.1 * jax.random.normal(next(ks), (c,), jnp.float32)
        p[f"{prefix}_var"] = 0.5 + jnp.abs(jax.random.normal(next(ks), (c,), jnp.float32))

    # upconv: ConvTranspose2d weight (Cin, Cout, 2, 2)
    p["up_w"] = 0.1 * jax.random.normal(next(ks), (up_cin, up_cout, 2, 2), jnp.float32)
    p["up_b"] = 0.1 * jax.random.normal(next(ks), (up_cout,), jnp.float32)
    bn("up", up_cout)
    # two inner convs: Conv2d weight (Cout, Cin, 3, 3)
    for i in range(NINNER):
        cin = conv_cin if i == 0 else conv_cout
        p[f"c{i}_w"] = 0.1 * jax.random.normal(next(ks), (conv_cout, cin, 3, 3), jnp.float32)
        p[f"c{i}_b"] = 0.1 * jax.random.normal(next(ks), (conv_cout,), jnp.float32)
        bn(f"c{i}", conv_cout)
    return p


if __name__ == "__main__":
    key = jax.random.PRNGKey(0)
    k_low, k_high, k_par = jax.random.split(key, 3)

    # low (2, 8, 8, 8) NCHW -> upconv -> (2, 4, 16, 16); high (2, 4, 16, 16)
    # concat -> 8 channels -> 2x conv3x3 -> output (2, 8, 16, 16)
    UP_CIN, UP_COUT = 8, 4
    CONV_CIN, CONV_COUT = 8, 8
    low = jax.random.normal(k_low, (2, UP_CIN, 8, 8), jnp.float32)
    high = jax.random.normal(k_high, (2, UP_COUT, 16, 16), jnp.float32)
    params = make_params(k_par, UP_CIN, UP_COUT, CONV_CIN, CONV_COUT)

    ref = jax.block_until_ready(reference_forward(low, high, params))

    # Default: whole batch in one grid step (M = N*H/2 rows per matmul) -> best on the
    # single-TensorCore chips (v5e / v6e): no per-step overhead, maximal MXU row occupancy.
    fwd = jax.jit(unet_expansion_block_forward)
    out = jax.block_until_ready(fwd(low, high, params))
    assert out.shape == (2, CONV_COUT, 16, 16), out.shape
    assert jnp.allclose(out, ref, atol=1e-4, rtol=1e-4), float(jnp.max(jnp.abs(out - ref)))

    # v7x configuration: one image per grid step, "parallel" grid -> one step per TensorCore.
    fwd_2tc = jax.jit(lambda l, h, q: unet_expansion_block_forward(l, h, q, images_per_step=1))
    out2 = jax.block_until_ready(fwd_2tc(low, high, params))
    assert jnp.allclose(out2, ref, atol=1e-4, rtol=1e-4), float(jnp.max(jnp.abs(out2 - ref)))

    print("KERNEL_OK")
</pallas_src>

<mosaic_0001>
module attributes {stable_mosaic.version = 11 : i64} {
  func.func @_fused_expansion_kernel(%arg0: i32, %arg1: memref<16x64xf32, #tpu.memory_space<vmem>>, %arg2: memref<16x128xf32, #tpu.memory_space<vmem>>, %arg3: memref<64x128xf32, #tpu.memory_space<vmem>>, %arg4: memref<768x256xf32, #tpu.memory_space<vmem>>, %arg5: memref<768x256xf32, #tpu.memory_space<vmem>>, %arg6: memref<3x256xf32, #tpu.memory_space<vmem>>, %arg7: memref<16x256xf32, #tpu.memory_space<vmem>>, %arg8: memref<20x256xf32, #tpu.memory_space<vmem>>, %arg9: memref<20x256xf32, #tpu.memory_space<vmem>>) attributes {dimension_semantics = [#tpu.dimension_semantics<parallel>], iteration_bounds = array<i64: 1>, scalar_prefetch = 0 : i64, scratch_operands = 2 : i64, tpu.core_type = #tpu.core_type<tc>, window_params = [{transform_indices = @transform_0, window_bounds = array<i64: 16, 64>}, {transform_indices = @transform_1, window_bounds = array<i64: 16, 128>}, {pipeline_mode = #tpu.pipeline_mode<synchronous>, transform_indices = @transform_2, window_bounds = array<i64: 64, 128>}, {pipeline_mode = #tpu.pipeline_mode<synchronous>, transform_indices = @transform_3, window_bounds = array<i64: 768, 256>}, {pipeline_mode = #tpu.pipeline_mode<synchronous>, transform_indices = @transform_4, window_bounds = array<i64: 768, 256>}, {pipeline_mode = #tpu.pipeline_mode<synchronous>, transform_indices = @transform_5, window_bounds = array<i64: 3, 256>}, {transform_indices = @transform_6, window_bounds = array<i64: 16, 256>}]} {
    %c0 = arith.constant 0 : index
    %c0_0 = arith.constant 0 : index
    %0 = vector.load %arg1[%c0, %c0_0] : memref<16x64xf32, #tpu.memory_space<vmem>>, vector<16x64xf32>
    %c0_1 = arith.constant 0 : index
    %c0_2 = arith.constant 0 : index
    %1 = vector.load %arg3[%c0_1, %c0_2] : memref<64x128xf32, #tpu.memory_space<vmem>>, vector<64x128xf32>
    %cst = arith.constant dense<0.000000e+00> : vector<16x128xf32>
    %2 = tpu.matmul %0, %1, %cst {dimension_numbers = #tpu.dot_dimension_numbers<[1], [0], [0], [1], [0, 0, 1, 1], [], []>} : vector<16x64xf32>, vector<64x128xf32>, vector<16x128xf32> -> vector<16x128xf32>
    %c0_3 = arith.constant 0 : index
    %c0_4 = arith.constant 0 : index
    %3 = vector.load %arg6[%c0_3, %c0_4] : memref<3x256xf32, #tpu.memory_space<vmem>>, vector<1x128xf32>
    %4 = vector.broadcast %3 : vector<1x128xf32> to vector<16x128xf32>
    %5 = arith.addf %2, %4 : vector<16x128xf32>
    %cst_5 = arith.constant 0.000000e+00 : f32
    %6 = vector.broadcast %cst_5 : f32 to vector<16x128xf32>
    %7 = arith.maximumf %5, %6 : vector<16x128xf32>
    %c0_6 = arith.constant 0 : index
    %c0_7 = arith.constant 0 : index
    %8 = vector.load %arg2[%c0_6, %c0_7] : memref<16x128xf32, #tpu.memory_space<vmem>>, vector<16x128xf32>
    %cst_8 = arith.constant 0.000000e+00 : f32
    %9 = vector.broadcast %cst_8 : f32 to vector<1x256xf32>
    %c0_9 = arith.constant 0 : index
    %c0_10 = arith.constant 0 : index
    %10 = vector.load %arg8[%c0_9, %c0_10] : memref<20x256xf32, #tpu.memory_space<vmem>>, vector<1x256xf32>
    tpu.vector_store %arg8[%c0_9, %c0_10], %9 {strides = array<i32>} : memref<20x256xf32, #tpu.memory_space<vmem>>, vector<1x256xf32>,
    %c9 = arith.constant 9 : index
    %c0_11 = arith.constant 0 : index
    %11 = vector.load %arg8[%c9, %c0_11] : memref<20x256xf32, #tpu.memory_space<vmem>>, vector<1x256xf32>
    tpu.vector_store %arg8[%c9, %c0_11], %9 {strides = array<i32>} : memref<20x256xf32, #tpu.memory_space<vmem>>, vector<1x256xf32>,
    %12 = vector.extract_strided_slice %7 {offsets = [0, 0], sizes = [8, 128], strides = [1, 1]} : vector<16x128xf32> to vector<8x128xf32>
    %c1 = arith.constant 1 : index
    %c0_12 = arith.constant 0 : index
    %13 = vector.load %arg8[%c1, %c0_12] : memref<20x256xf32, #tpu.memory_space<vmem>>, vector<8x128xf32>
    tpu.vector_store %arg8[%c1, %c0_12], %12 {strides = array<i32>} : memref<20x256xf32, #tpu.memory_space<vmem>>, vector<8x128xf32>,
    %14 = vector.extract_strided_slice %8 {offsets = [0, 0], sizes = [8, 128], strides = [1, 1]} : vector<16x128xf32> to vector<8x128xf32>
    %c1_13 = arith.constant 1 : index
    %c128 = arith.constant 128 : index
    %15 = vector.load %arg8[%c1_13, %c128] : memref<20x256xf32, #tpu.memory_space<vmem>>, vector<8x128xf32>
    tpu.vector_store %arg8[%c1_13, %c128], %14 {strides = array<i32>} : memref<20x256xf32, #tpu.memory_space<vmem>>, vector<8x128xf32>,
    %c10 = arith.constant 10 : index
    %c0_14 = arith.constant 0 : index
    %16 = vector.load %arg8[%c10, %c0_14] : memref<20x256xf32, #tpu.memory_space<vmem>>, vector<1x256xf32>
    tpu.vector_store %arg8[%c10, %c0_14], %9 {strides = array<i32>} : memref<20x256xf32, #tpu.memory_space<vmem>>, vector<1x256xf32>,
    %c19 = arith.constant 19 : index
    %c0_15 = arith.constant 0 : index
    %17 = vector.load %arg8[%c19, %c0_15] : memref<20x256xf32, #tpu.memory_space<vmem>>, vector<1x256xf32>
    tpu.vector_store %arg8[%c19, %c0_15], %9 {strides = array<i32>} : memref<20x256xf32, #tpu.memory_space<vmem>>, vector<1x256xf32>,
    %18 = vector.extract_strided_slice %7 {offsets = [8, 0], sizes = [8, 128], strides = [1, 1]} : vector<16x128xf32> to vector<8x128xf32>
    %c11 = arith.constant 11 : index
    %c0_16 = arith.constant 0 : index
    %19 = vector.load %arg8[%c11, %c0_16] : memref<20x256xf32, #tpu.memory_space<vmem>>, vector<8x128xf32>
    tpu.vector_store %arg8[%c11, %c0_16], %18 {strides = array<i32>} : memref<20x256xf32, #tpu.memory_space<vmem>>, vector<8x128xf32>,
    %20 = vector.extract_strided_slice %8 {offsets = [8, 0], sizes = [8, 128], strides = [1, 1]} : vector<16x128xf32> to vector<8x128xf32>
    %c11_17 = arith.constant 11 : index
    %c128_18 = arith.constant 128 : index
    %21 = vector.load %arg8[%c11_17, %c128_18] : memref<20x256xf32, #tpu.memory_space<vmem>>, vector<8x128xf32>
    tpu.vector_store %arg8[%c11_17, %c128_18], %20 {strides = array<i32>} : memref<20x256xf32, #tpu.memory_space<vmem>>, vector<8x128xf32>,
    %c0_19 = arith.constant 0 : index
    %c0_20 = arith.constant 0 : index
    %22 = vector.load %arg8[%c0_19, %c0_20] : memref<20x256xf32, #tpu.memory_space<vmem>>, vector<18x256xf32>
    %c1_21 = arith.constant 1 : index
    %c0_22 = arith.constant 0 : index
    %23 = vector.load %arg8[%c1_21, %c0_22] : memref<20x256xf32, #tpu.memory_space<vmem>>, vector<18x256xf32>
    %c2 = arith.constant 2 : index
    %c0_23 = arith.constant 0 : index
    %24 = vector.load %arg8[%c2, %c0_23] : memref<20x256xf32, #tpu.memory_space<vmem>>, vector<18x256xf32>
    %25 = tpu.concatenate %22, %23, %24 in 1 : vector<18x256xf32>, vector<18x256xf32>, vector<18x256xf32> -> vector<18x768xf32>
    %c0_24 = arith.constant 0 : index
    %c0_25 = arith.constant 0 : index
    %26 = vector.load %arg4[%c0_24, %c0_25] : memref<768x256xf32, #tpu.memory_space<vmem>>, vector<768x256xf32>
    %cst_26 = arith.constant dense<0.000000e+00> : vector<18x256xf32>
    %27 = tpu.matmul %25, %26, %cst_26 {dimension_numbers = #tpu.dot_dimension_numbers<[1], [0], [0], [1], [0, 0, 1, 1], [], []>} : vector<18x768xf32>, vector<768x256xf32>, vector<18x256xf32> -> vector<18x256xf32>
    %c1_27 = arith.constant 1 : index
    %c0_28 = arith.constant 0 : index
    %28 = vector.load %arg6[%c1_27, %c0_28] : memref<3x256xf32, #tpu.memory_space<vmem>>, vector<1x256xf32>
    %29 = vector.broadcast %28 : vector<1x256xf32> to vector<18x256xf32>
    %30 = arith.addf %27, %29 : vector<18x256xf32>
    %cst_29 = arith.constant 0.000000e+00 : f32
    %31 = vector.broadcast %cst_29 : f32 to vector<18x256xf32>
    %32 = arith.maximumf %30, %31 : vector<18x256xf32>
    %cst_30 = arith.constant 0.000000e+00 : f32
    %33 = vector.broadcast %cst_30 : f32 to vector<1x256xf32>
    %c0_31 = arith.constant 0 : index
    %c0_32 = arith.constant 0 : index
    %34 = vector.load %arg9[%c0_31, %c0_32] : memref<20x256xf32, #tpu.memory_space<vmem>>, vector<1x256xf32>
    tpu.vector_store %arg9[%c0_31, %c0_32], %33 {strides = array<i32>} : memref<20x256xf32, #tpu.memory_space<vmem>>, vector<1x256xf32>,
    %c9_33 = arith.constant 9 : index
    %c0_34 = arith.constant 0 : index
    %35 = vector.load %arg9[%c9_33, %c0_34] : memref<20x256xf32, #tpu.memory_space<vmem>>, vector<1x256xf32>
    tpu.vector_store %arg9[%c9_33, %c0_34], %33 {strides = array<i32>} : memref<20x256xf32, #tpu.memory_space<vmem>>, vector<1x256xf32>,
    %36 = vector.extract_strided_slice %32 {offsets = [0, 0], sizes = [8, 256], strides = [1, 1]} : vector<18x256xf32> to vector<8x256xf32>
    %c1_35 = arith.constant 1 : index
    %c0_36 = arith.constant 0 : index
    %37 = vector.load %arg9[%c1_35, %c0_36] : memref<20x256xf32, #tpu.memory_space<vmem>>, vector<8x256xf32>
    tpu.vector_store %arg9[%c1_35, %c0_36], %36 {strides = array<i32>} : memref<20x256xf32, #tpu.memory_space<vmem>>, vector<8x256xf32>,
    %c10_37 = arith.constant 10 : index
    %c0_38 = arith.constant 0 : index
    %38 = vector.load %arg9[%c10_37, %c0_38] : memref<20x256xf32, #tpu.memory_space<vmem>>, vector<1x256xf32>
    tpu.vector_store %arg9[%c10_37, %c0_38], %33 {strides = array<i32>} : memref<20x256xf32, #tpu.memory_space<vmem>>, vector<1x256xf32>,
    %c19_39 = arith.constant 19 : index
    %c0_40 = arith.constant 0 : index
    %39 = vector.load %arg9[%c19_39, %c0_40] : memref<20x256xf32, #tpu.memory_space<vmem>>, vector<1x256xf32>
    tpu.vector_store %arg9[%c19_39, %c0_40], %33 {strides = array<i32>} : memref<20x256xf32, #tpu.memory_space<vmem>>, vector<1x256xf32>,
    %40 = vector.extract_strided_slice %32 {offsets = [10, 0], sizes = [8, 256], strides = [1, 1]} : vector<18x256xf32> to vector<8x256xf32>
    %c11_41 = arith.constant 11 : index
    %c0_42 = arith.constant 0 : index
    %41 = vector.load %arg9[%c11_41, %c0_42] : memref<20x256xf32, #tpu.memory_space<vmem>>, vector<8x256xf32>
    tpu.vector_store %arg9[%c11_41, %c0_42], %40 {strides = array<i32>} : memref<20x256xf32, #tpu.memory_space<vmem>>, vector<8x256xf32>,
    %c0_43 = arith.constant 0 : index
    %c0_44 = arith.constant 0 : index
    %42 = vector.load %arg9[%c0_43, %c0_44] : memref<20x256xf32, #tpu.memory_space<vmem>>, vector<18x256xf32>
    %c1_45 = arith.constant 1 : index
    %c0_46 = arith.constant 0 : index
    %43 = vector.load %arg9[%c1_45, %c0_46] : memref<20x256xf32, #tpu.memory_space<vmem>>, vector<18x256xf32>
    %c2_47 = arith.constant 2 : index
    %c0_48 = arith.constant 0 : index
    %44 = vector.load %arg9[%c2_47, %c0_48] : memref<20x256xf32, #tpu.memory_space<vmem>>, vector<18x256xf32>
    %45 = tpu.concatenate %42, %43, %44 in 1 : vector<18x256xf32>, vector<18x256xf32>, vector<18x256xf32> -> vector<18x768xf32>
    %c0_49 = arith.constant 0 : index
    %c0_50 = arith.constant 0 : index
    %46 = vector.load %arg5[%c0_49, %c0_50] : memref<768x256xf32, #tpu.memory_space<vmem>>, vector<768x256xf32>
    %cst_51 = arith.constant dense<0.000000e+00> : vector<18x256xf32>
    %47 = tpu.matmul %45, %46, %cst_51 {dimension_numbers = #tpu.dot_dimension_numbers<[1], [0], [0], [1], [0, 0, 1, 1], [], []>} : vector<18x768xf32>, vector<768x256xf32>, vector<18x256xf32> -> vector<18x256xf32>
    %c2_52 = arith.constant 2 : index
    %c0_53 = arith.constant 0 : index
    %48 = vector.load %arg6[%c2_52, %c0_53] : memref<3x256xf32, #tpu.memory_space<vmem>>, vector<1x256xf32>
    %49 = vector.broadcast %48 : vector<1x256xf32> to vector<18x256xf32>
    %50 = arith.addf %47, %49 : vector<18x256xf32>
    %cst_54 = arith.constant 0.000000e+00 : f32
    %51 = vector.broadcast %cst_54 : f32 to vector<18x256xf32>
    %52 = arith.maximumf %50, %51 : vector<18x256xf32>
    %53 = vector.extract_strided_slice %52 {offsets = [0, 0], sizes = [8, 256], strides = [1, 1]} : vector<18x256xf32> to vector<8x256xf32>
    %c0_55 = arith.constant 0 : index
    %c0_56 = arith.constant 0 : index
    %54 = vector.load %arg7[%c0_55, %c0_56] : memref<16x256xf32, #tpu.memory_space<vmem>>, vector<8x256xf32>
    tpu.vector_store %arg7[%c0_55, %c0_56], %53 {strides = array<i32>} : memref<16x256xf32, #tpu.memory_space<vmem>>, vector<8x256xf32>,
    %55 = vector.extract_strided_slice %52 {offsets = [10, 0], sizes = [8, 256], strides = [1, 1]} : vector<18x256xf32> to vector<8x256xf32>
    %c8 = arith.constant 8 : index
    %c0_57 = arith.constant 0 : index
    %56 = vector.load %arg7[%c8, %c0_57] : memref<16x256xf32, #tpu.memory_space<vmem>>, vector<8x256xf32>
    tpu.vector_store %arg7[%c8, %c0_57], %55 {strides = array<i32>} : memref<16x256xf32, #tpu.memory_space<vmem>>, vector<8x256xf32>,
    return
  }
  func.func @transform_0(%arg0: i32) -> (i32, i32) {
    %c0_i32 = arith.constant 0 : i32
    %c0_i32_0 = arith.constant 0 : i32
    return %arg0, %c0_i32 : i32, i32
  }
  func.func @transform_1(%arg0: i32) -> (i32, i32) {
    %c0_i32 = arith.constant 0 : i32
    %c0_i32_0 = arith.constant 0 : i32
    return %arg0, %c0_i32 : i32, i32
  }
  func.func @transform_2(%arg0: i32) -> (i32, i32) {
    %c0_i32 = arith.constant 0 : i32
    %c0_i32_0 = arith.constant 0 : i32
    %c0_i32_1 = arith.constant 0 : i32
    return %c0_i32, %c0_i32_0 : i32, i32
  }
  func.func @transform_3(%arg0: i32) -> (i32, i32) {
    %c0_i32 = arith.constant 0 : i32
    %c0_i32_0 = arith.constant 0 : i32
    %c0_i32_1 = arith.constant 0 : i32
    return %c0_i32, %c0_i32_0 : i32, i32
  }
  func.func @transform_4(%arg0: i32) -> (i32, i32) {
    %c0_i32 = arith.constant 0 : i32
    %c0_i32_0 = arith.constant 0 : i32
    %c0_i32_1 = arith.constant 0 : i32
    return %c0_i32, %c0_i32_0 : i32, i32
  }
  func.func @transform_5(%arg0: i32) -> (i32, i32) {
    %c0_i32 = arith.constant 0 : i32
    %c0_i32_0 = arith.constant 0 : i32
    %c0_i32_1 = arith.constant 0 : i32
    return %c0_i32, %c0_i32_0 : i32, i32
  }
  func.func @transform_6(%arg0: i32) -> (i32, i32) {
    %c0_i32 = arith.constant 0 : i32
    %c0_i32_0 = arith.constant 0 : i32
    return %arg0, %c0_i32 : i32, i32
  }
}

</mosaic_0001>

<bundles_post_ra>
// kernel: tile.18
= control target key start
LH: loop header
LB: loop body
LE: loop exit
PB: predicated region body
PF: predicated region fallthrough
CT: control target
= control target key end

     0   :  { %s40_s0 = inlined_call_operand.vmem [shape: f32[4], index: 0, kind: input, shape index: {}]   ;;  %s41_s1 = inlined_call_operand.vmem [shape: f32[32,4], index: 1, kind: output, shape index: {}]  }
   0x1   :  { %v4_v0 = vld [vmem:[%s40_s0] ss:$0 sm:$0xff] }
   0x2   :  { %5 = vst [vmem:[%s41_s1] sm:$0xff] %v4_v0  ;;  %12 = vst [vmem:[%s41_s1 + $0x8] sm:$0xff] %v4_v0 }
   0x3   :  { %13 = vst [vmem:[%s41_s1 + $0x10] sm:$0xff] %v4_v0  ;;  %14 = vst [vmem:[%s41_s1 + $0x18] sm:$0xff] %v4_v0 }

// kernel: tile.19
= control target key start
LH: loop header
LB: loop body
LE: loop exit
PB: predicated region body
PF: predicated region fallthrough
CT: control target
= control target key end

     0   :  { %s259_s10 = smov 124   ;;  %s260_s11 = smov 116   ;;  %vm3_vm0 = vcmask 31744   ;;  %vm9_vm1 = vcmask 1048544   ;;  %vm15_vm2 = vcmask 1015744   ;;  %vm21_vm3 = vcmask 982944   ;;  %s399_s0 = inlined_call_operand.vmem [shape: f32[32,4], index: 0, kind: input, shape index: {}]   ;;  %s400_s1 = inlined_call_operand.vmem [shape: f32[128], index: 1, kind: output, shape index: {}]  }
   0x1   :  { %v197_v0 = vld [vmem:[%s399_s0 + $0x1f] sm:$0x1]   ;;  %v199_v1 = vld [vmem:[%s399_s0 + $0x1d] sm:$0x1]   ;;  %v198_v2 = vld [vmem:[%s399_s0 + $0x1e] sm:$0x1]  }
   0x2   :  { %7 = vrot.lane.b32.xlu0 %v197_v0, %s259_s10  ;;  %19 = vrot.lane.b32.xlu1 %v199_v1, %s260_s11  ;;  %v200_v3 = vld [vmem:[%s399_s0 + $0x1c] sm:$0x1]   ;;  %s261_s16 = smov 120   ;;  %s262_s17 = smov 112   ;;  %v201_v4 = vld [vmem:[%s399_s0 + $0x1b] sm:$0x1]  }
   0x3   :  { %v202_v5 = vld [vmem:[%s399_s0 + $0x1a] sm:$0x1]   ;;  %s263_s22 = smov 108   ;;  %s264_s23 = smov 104   ;;  %v203_v6 = vld [vmem:[%s399_s0 + $0x19] sm:$0x1]  }
   0x4   :  { %v204_v7 = vld [vmem:[%s399_s0 + $0x18] sm:$0x1]   ;;  %s265_s28 = smov 100   ;;  %s266_s29 = smov 96   ;;  %v205_v8 = vld [vmem:[%s399_s0 + $0x17] sm:$0x1]  }
   0x5   :  { %v206_v9 = vld [vmem:[%s399_s0 + $0x16] sm:$0x1]   ;;  %v2_v10 = vld [vmem:[%s399_s0] sm:$0x1]   ;;  %s267_s7 = smov 92   ;;  %s268_s8 = smov 88  }
   0x6   :  { %13 = vrot.lane.b32.xlu0 %v198_v2, %s261_s16  ;;  %25 = vrot.lane.b32.xlu1 %v200_v3, %s262_s17  ;;  %4 = vst.msk [vmem:[#allocation0] sm:$0x1] %vm3_vm0, %v2_v10   ;;  %v207_v11 = vld [vmem:[%s399_s0 + $0x15] sm:$0x1]   ;;  %v208_v12 = vld [vmem:[%s399_s0 + $0x14] sm:$0x1]  }
   0x7   :  { %s269_s13 = smov 84   ;;  %s270_s14 = smov 80   ;;  %v209_v13 = vld [vmem:[%s399_s0 + $0x13] sm:$0x1]   ;;  %v210_v14 = vld [vmem:[%s399_s0 + $0x12] sm:$0x1]  }
   0x8   :  { %s271_s19 = smov 76   ;;  %s272_s20 = smov 72   ;;  %v211_v15 = vld [vmem:[%s399_s0 + $0x11] sm:$0x1]   ;;  %v212_v16 = vld [vmem:[%s399_s0 + $0x10] sm:$0x1]  }
   0x9   :  { %s273_s25 = smov 68   ;;  %s274_s26 = smov 64   ;;  %v213_v17 = vld [vmem:[%s399_s0 + $0xf] sm:$0x1]   ;;  %v214_v18 = vld [vmem:[%s399_s0 + $0xe] sm:$0x1]  }
   0xa   :  { %31 = vrot.lane.b32.xlu0 %v201_v4, %s263_s22  ;;  %37 = vrot.lane.b32.xlu1 %v202_v5, %s264_s23  ;;  %s275_s2 = smov 60   ;;  %s276_s3 = smov 56   ;;  %v215_v19 = vld [vmem:[%s399_s0 + $0xd] sm:$0x1]   ;;  %v216_v20 = vld [vmem:[%s399_s0 + $0xc] sm:$0x1]  }
   0xb   :  { %s278_s9 = smov 48   ;;  %v217_v21 = vld [vmem:[%s399_s0 + $0xb] sm:$0x1]   ;;  %v218_v22 = vld [vmem:[%s399_s0 + $0xa] sm:$0x1]   ;;  %s280_s15 = smov 40  }
   0xc   :  { %v219_v23 = vld [vmem:[%s399_s0 + $0x9] sm:$0x1]   ;;  %v220_v24 = vld [vmem:[%s399_s0 + $0x8] sm:$0x1]   ;;  %s282_s21 = smov 32   ;;  %s284_s27 = smov 24  }
   0xd   :  { %v221_v25 = vld [vmem:[%s399_s0 + $0x7] sm:$0x1]   ;;  %v222_v26 = vld [vmem:[%s399_s0 + $0x6] sm:$0x1]   ;;  %v223_v27 = vld [vmem:[%s399_s0 + $0x5] sm:$0x1]  }
   0xe   :  { %43 = vrot.lane.b32.xlu0 %v203_v6, %s265_s28  ;;  %49 = vrot.lane.b32.xlu1 %v204_v7, %s266_s29  ;;  %v224_v28 = vld [vmem:[%s399_s0 + $0x4] sm:$0x1]   ;;  %s286_s4 = smov 16   ;;  %v225_v29 = vld [vmem:[%s399_s0 + $0x3] sm:$0x1]   ;;  %s288_s10 = smov 8  }
   0xf   :  { %v226_v30 = vld [vmem:[%s399_s0 + $0x2] sm:$0x1]   ;;  %v227_v31 = vld [vmem:[%s399_s0 + $0x1] sm:$0x1]   ;;  %s289_s0 = smov 4   ;;  %vm27_vm4 = vcmask 950144  }
  0x10   :  { %vm33_vm5 = vcmask 917344   ;;  %vm39_vm6 = vcmask 884544   ;;  %vm45_vm7 = vcmask 851744   ;;  %vm51_vm8 = vcmask 818944  }
  0x11   :  { %vm57_vm9 = vcmask 786144   ;;  %vm63_vm10 = vcmask 753344   ;;  %vm69_vm11 = vcmask 720544   ;;  %vm75_vm12 = vcmask 687744  }
  0x12   :  { %55 = vrot.lane.b32.xlu0 %v205_v8, %s267_s7  ;;  %61 = vrot.lane.b32.xlu1 %v206_v9, %s268_s8  ;;  %s277_s8 = smov 52   ;;  %vm81_vm13 = vcmask 654944   ;;  %vm87_vm14 = vcmask 622144   ;;  %vm93_vm15 = vcmask 589344   ;;  %vm99_vm0 = vcmask 556544  }
  0x16   :  { %67 = vrot.lane.b32.xlu0 %v207_v11, %s269_s13  ;;  %73 = vrot.lane.b32.xlu1 %v208_v12, %s270_s14  ;;  %s279_s14 = smov 44  }
  0x1a   :  { %79 = vrot.lane.b32.xlu0 %v209_v13, %s271_s19  ;;  %85 = vrot.lane.b32.xlu1 %v210_v14, %s272_s20  ;;  %s281_s20 = smov 36  }
  0x1e   :  { %91 = vrot.lane.b32.xlu0 %v211_v15, %s273_s25  ;;  %97 = vrot.lane.b32.xlu1 %v212_v16, %s274_s26  ;;  %s283_s26 = smov 28  }
  0x22   :  { %103 = vrot.lane.b32.xlu0 %v213_v17, %s275_s2  ;;  %109 = vrot.lane.b32.xlu1 %v214_v18, %s276_s3  ;;  %s285_s3 = smov 20  }
  0x26   :  { %115 = vrot.lane.b32.xlu0 %v215_v19, %s277_s8  ;;  %121 = vrot.lane.b32.xlu1 %v216_v20, %s278_s9  ;;  %s287_s9 = smov 12  }
  0x2a   :  { %127 = vrot.lane.b32.xlu0 %v217_v21, %s279_s14  ;;  %133 = vrot.lane.b32.xlu1 %v218_v22, %s280_s15 }
  0x2e   :  { %139 = vrot.lane.b32.xlu0 %v219_v23, %s281_s20  ;;  %145 = vrot.lane.b32.xlu1 %v220_v24, %s282_s21 }
  0x32   :  { %151 = vrot.lane.b32.xlu0 %v221_v25, %s283_s26  ;;  %157 = vrot.lane.b32.xlu1 %v222_v26, %s284_s27 }
  0x36   :  { %163 = vrot.lane.b32.xlu0 %v223_v27, %s285_s3  ;;  %169 = vrot.lane.b32.xlu1 %v224_v28, %s286_s4 }
  0x3a   :  { %175 = vrot.lane.b32.xlu0 %v225_v29, %s287_s9  ;;  %181 = vrot.lane.b32.xlu1 %v226_v30, %s288_s10 }
  0x3e   :  { %187 = vrot.lane.b32.xlu0 %v227_v31, %s289_s0 }
  0x74   :  { %v8_v32 = vpop.permute.xlu0 %7   ;;  %v20_v33 = vpop.permute.xlu1 %19  }
  0x75   :  { %10 = vst.msk [vmem:[#allocation0] sm:$0x1] %vm9_vm1, %v8_v32   ;;  %vm105_vm1 = vcmask 523744  }
  0x78   :  { %v14_v34 = vpop.permute.xlu0 %13   ;;  %v26_v35 = vpop.permute.xlu1 %25  }
  0x79   :  { %16 = vst.msk [vmem:[#allocation0] sm:$0x1] %vm15_vm2, %v14_v34   ;;  %vm111_vm2 = vcmask 490944  }
  0x7a   :  { %22 = vst.msk [vmem:[#allocation0] sm:$0x1] %vm21_vm3, %v20_v33   ;;  %vm117_vm3 = vcmask 458144  }
  0x7b   :  { %28 = vst.msk [vmem:[#allocation0] sm:$0x1] %vm27_vm4, %v26_v35   ;;  %vm123_vm4 = vcmask 425344  }
  0x7c   :  { %v32_v36 = vpop.permute.xlu0 %31   ;;  %v38_v37 = vpop.permute.xlu1 %37  }
  0x7d   :  { %34 = vst.msk [vmem:[#allocation0] sm:$0x1] %vm33_vm5, %v32_v36   ;;  %vm129_vm5 = vcmask 392544  }
  0x7e   :  { %40 = vst.msk [vmem:[#allocation0] sm:$0x1] %vm39_vm6, %v38_v37   ;;  %vm135_vm6 = vcmask 359744  }
  0x80   :  { %v44_v38 = vpop.permute.xlu0 %43   ;;  %v50_v39 = vpop.permute.xlu1 %49  }
  0x81   :  { %46 = vst.msk [vmem:[#allocation0] sm:$0x1] %vm45_vm7, %v44_v38   ;;  %vm141_vm7 = vcmask 326944  }
  0x82   :  { %52 = vst.msk [vmem:[#allocation0] sm:$0x1] %vm51_vm8, %v50_v39   ;;  %vm147_vm8 = vcmask 294144  }
  0x84   :  { %v56_v40 = vpop.permute.xlu0 %55   ;;  %v62_v41 = vpop.permute.xlu1 %61  }
  0x85   :  { %58 = vst.msk [vmem:[#allocation0] sm:$0x1] %vm57_vm9, %v56_v40   ;;  %vm153_vm9 = vcmask 261344  }
  0x86   :  { %64 = vst.msk [vmem:[#allocation0] sm:$0x1] %vm63_vm10, %v62_v41   ;;  %vm159_vm10 = vcmask 228544  }
  0x88   :  { %v68_v42 = vpop.permute.xlu0 %67   ;;  %v74_v43 = vpop.permute.xlu1 %73  }
  0x89   :  { %70 = vst.msk [vmem:[#allocation0] sm:$0x1] %vm69_vm11, %v68_v42   ;;  %vm165_vm11 = vcmask 195744  }
  0x8a   :  { %76 = vst.msk [vmem:[#allocation0] sm:$0x1] %vm75_vm12, %v74_v43   ;;  %vm171_vm12 = vcmask 162944  }
  0x8c   :  { %v80_v44 = vpop.permute.xlu0 %79   ;;  %v86_v45 = vpop.permute.xlu1 %85  }
  0x8d   :  { %82 = vst.msk [vmem:[#allocation0] sm:$0x1] %vm81_vm13, %v80_v44   ;;  %vm177_vm13 = vcmask 130144  }
  0x8e   :  { %88 = vst.msk [vmem:[#allocation0] sm:$0x1] %vm87_vm14, %v86_v45   ;;  %vm183_vm14 = vcmask 97344  }
  0x90   :  { %v92_v46 = vpop.permute.xlu0 %91   ;;  %v98_v47 = vpop.permute.xlu1 %97  }
  0x91   :  { %94 = vst.msk [vmem:[#allocation0] sm:$0x1] %vm93_vm15, %v92_v46   ;;  %vm189_vm15 = vcmask 64544  }
  0x92   :  { %100 = vst.msk [vmem:[#allocation0] sm:$0x1] %vm99_vm0, %v98_v47  }
  0x94   :  { %v104_v48 = vpop.permute.xlu0 %103   ;;  %v110_v49 = vpop.permute.xlu1 %109  }
  0x95   :  { %106 = vst.msk [vmem:[#allocation0] sm:$0x1] %vm105_vm1, %v104_v48  }
  0x96   :  { %112 = vst.msk [vmem:[#allocation0] sm:$0x1] %vm111_vm2, %v110_v49  }
  0x98   :  { %v116_v50 = vpop.permute.xlu0 %115   ;;  %v122_v51 = vpop.permute.xlu1 %121  }
  0x99   :  { %118 = vst.msk [vmem:[#allocation0] sm:$0x1] %vm117_vm3, %v116_v50  }
  0x9a   :  { %124 = vst.msk [vmem:[#allocation0] sm:$0x1] %vm123_vm4, %v122_v51  }
  0x9c   :  { %v128_v52 = vpop.permute.xlu0 %127   ;;  %v134_v53 = vpop.permute.xlu1 %133  }
  0x9d   :  { %130 = vst.msk [vmem:[#allocation0] sm:$0x1] %vm129_vm5, %v128_v52  }
  0x9e   :  { %136 = vst.msk [vmem:[#allocation0] sm:$0x1] %vm135_vm6, %v134_v53  }
  0xa0   :  { %v140_v54 = vpop.permute.xlu0 %139   ;;  %v146_v55 = vpop.permute.xlu1 %145  }
  0xa1   :  { %142 = vst.msk [vmem:[#allocation0] sm:$0x1] %vm141_vm7, %v140_v54  }
  0xa2   :  { %148 = vst.msk [vmem:[#allocation0] sm:$0x1] %vm147_vm8, %v146_v55  }
  0xa4   :  { %v152_v56 = vpop.permute.xlu0 %151   ;;  %v158_v57 = vpop.permute.xlu1 %157  }
  0xa5   :  { %154 = vst.msk [vmem:[#allocation0] sm:$0x1] %vm153_vm9, %v152_v56  }
  0xa6   :  { %160 = vst.msk [vmem:[#allocation0] sm:$0x1] %vm159_vm10, %v158_v57  }
  0xa8   :  { %v164_v58 = vpop.permute.xlu0 %163   ;;  %v170_v59 = vpop.permute.xlu1 %169  }
  0xa9   :  { %166 = vst.msk [vmem:[#allocation0] sm:$0x1] %vm165_vm11, %v164_v58  }
  0xaa   :  { %172 = vst.msk [vmem:[#allocation0] sm:$0x1] %vm171_vm12, %v170_v59  }
  0xac   :  { %v176_v60 = vpop.permute.xlu0 %175   ;;  %v182_v61 = vpop.permute.xlu1 %181  }
  0xad   :  { %178 = vst.msk [vmem:[#allocation0] sm:$0x1] %vm177_vm13, %v176_v60  }
  0xae   :  { %184 = vst.msk [vmem:[#allocation0] sm:$0x1] %vm183_vm14, %v182_v61  }
  0xb0   :  { %v188_v62 = vpop.permute.xlu0 %187  }
  0xb1   :  { %190 = vst.msk [vmem:[#allocation0] sm:$0x1] %vm189_vm15, %v188_v62  }
  0xb8   :  { %v194_v63 = vld [vmem:[#allocation0] sm:$0x1] }
  0xb9   :  { %196 = vst [vmem:[%s400_s1] sm:$0x1] %v194_v63 }

// kernel: tile.28
= control target key start
LH: loop header
LB: loop body
LE: loop exit
PB: predicated region body
PF: predicated region fallthrough
CT: control target
= control target key end

     0   :  { %s40_s0 = inlined_call_operand.vmem [shape: f32[8], index: 0, kind: input, shape index: {}]   ;;  %s41_s1 = inlined_call_operand.vmem [shape: f32[32,8], index: 1, kind: output, shape index: {}]  }
   0x1   :  { %v4_v0 = vld [vmem:[%s40_s0] ss:$0 sm:$0xff] }
   0x2   :  { %5 = vst [vmem:[%s41_s1] sm:$0xff] %v4_v0  ;;  %12 = vst [vmem:[%s41_s1 + $0x8] sm:$0xff] %v4_v0 }
   0x3   :  { %13 = vst [vmem:[%s41_s1 + $0x10] sm:$0xff] %v4_v0  ;;  %14 = vst [vmem:[%s41_s1 + $0x18] sm:$0xff] %v4_v0 }

// kernel: unet_expansion_block_forward.1
= control target key start
LH: loop header
LB: loop body
LE: loop exit
PB: predicated region body
PF: predicated region fallthrough
CT: control target
= control target key end

     0   :  { %vm38_vm0 = vcmask 523264   ;;  %vm179_vm2 = vcmask 1046528   ;;  %vm200_vm3 = vcmask 1045504   ;;  %vm702_vm4 = vcmask 1040384   ;;  %s3039_s2 = inlined_call_operand.vmem [shape: f32[64,128], index: 2, kind: input, shape index: {}]   ;;  %s3040_s0 = inlined_call_operand.vmem [shape: f32[16,64], index: 0, kind: input, shape index: {}]   ;;  %s3041_s3 = inlined_call_operand.vmem [shape: f32[768,256], index: 3, kind: input, shape index: {}]   ;;  %s3042_s1 = inlined_call_operand.vmem [shape: f32[16,128], index: 1, kind: input, shape index: {}]   ;;  %s3043_s5 = inlined_call_operand.vmem [shape: f32[3,256], index: 5, kind: input, shape index: {}]   ;;  %s3044_s4 = inlined_call_operand.vmem [shape: f32[768,256], index: 4, kind: input, shape index: {}]   ;;  %s3045_s6 = inlined_call_operand.vmem [shape: f32[16,256], index: 6, kind: output, shape index: {}]  }
   0x1   :  { %v25_v0 = vld [vmem:[%s3039_s2] sm:$0xff]  ;;  %v26_v1 = vld [vmem:[%s3039_s2 + $0x8] sm:$0xff]  ;;  %v27_v2 = vld [vmem:[%s3039_s2 + $0x10] sm:$0xff] }
   0x2   :  { %v1287_v3 = vpack.c.bf16 %v26_v1, %v25_v0  ;;  %v28_v4 = vld [vmem:[%s3039_s2 + $0x18] sm:$0xff]  ;;  %v29_v6 = vld [vmem:[%s3039_s2 + $0x20] sm:$0xff]  ;;  %v30_v7 = vld [vmem:[%s3039_s2 + $0x28] sm:$0xff] }
   0x3   :  { %v1291_v5 = vpack.c.bf16 %v28_v4, %v27_v2  ;;  %v23_v8 = vld [vmem:[%s3040_s0] sm:$0xff]  ;;  %v218_v9 = vld [vmem:[%s3041_s3 + $0x8] sm:$0xff]  ;;  %v220_v10 = vld [vmem:[%s3041_s3 + $0x18] sm:$0xff]  ;;  %v1295_v16 = vpack.c.bf16 %v30_v7, %v29_v6 }
   0x4   :  { %1288 = vmatprep.subr.bf16.mxu0 %v1287_v3  ;;  %1284 = vmatprep.mubr.msk.f32.mxu0 %vm38_vm0, %v23_v8  ;;  %v31_v11 = vld [vmem:[%s3039_s2 + $0x30] sm:$0xff]  ;;  %v1303_v12 = vpack.c.bf16 %v220_v10, %v218_v9  ;;  %v217_v13 = vld [vmem:[%s3041_s3] sm:$0xff]  ;;  %v222_v15 = vld [vmem:[%s3041_s3 + $0x28] sm:$0xff] }
   0x5   :  { %1290 = vmatpush3.bf16.msra.mxu0 %v1287_v3  ;;  %v219_v14 = vld [vmem:[%s3041_s3 + $0x10] sm:$0xff]  ;;  %v224_v18 = vld [vmem:[%s3041_s3 + $0x38] sm:$0xff]  ;;  %v221_v19 = vld [vmem:[%s3041_s3 + $0x20] sm:$0xff] }
   0x6   :  { %1292 = vmatprep.subr.bf16.mxu0 %v1291_v5  ;;  %v1305_v17 = vpack.c.bf16 %v219_v14, %v217_v13  ;;  %v223_v20 = vld [vmem:[%s3041_s3 + $0x30] sm:$0xff]  ;;  %v32_v21 = vld [vmem:[%s3039_s2 + $0x38] sm:$0xff]  ;;  %1304 = vmatprep.subr.bf16.mxu1 %v1303_v12  ;;  %v1307_v22 = vpack.c.bf16 %v224_v18, %v222_v15  ;;  %v226_v23 = vld [vmem:[%s3041_s3 + $0x48] sm:$0xff] }
   0x7   :  { %v228_v24 = vld [vmem:[%s3041_s3 + $0x58] sm:$0xff]  ;;  %v1309_v25 = vpack.c.bf16 %v223_v20, %v221_v19  ;;  %v225_v27 = vld [vmem:[%s3041_s3 + $0x40] sm:$0xff]  ;;  %v227_v28 = vld [vmem:[%s3041_s3 + $0x50] sm:$0xff]  ;;  %v1299_v29 = vpack.c.bf16 %v32_v21, %v31_v11 }
   0x8   :  { %1306 = vmatpush1.bf16.msra.mxu1 %v1305_v17  ;;  %v1311_v26 = vpack.c.bf16 %v228_v24, %v226_v23  ;;  %v230_v30 = vld [vmem:[%s3041_s3 + $0x68] sm:$0xff]  ;;  %v232_v31 = vld [vmem:[%s3041_s3 + $0x78] sm:$0xff]  ;;  %v1313_v32 = vpack.c.bf16 %v227_v28, %v225_v27  ;;  %v229_v34 = vld [vmem:[%s3041_s3 + $0x60] sm:$0xff] }
   0x9   :  { %1294 = vmatpush3.bf16.msra.mxu0 %v1291_v5  ;;  %1308 = vmatprep.subr.bf16.mxu1 %v1307_v22  ;;  %v1315_v33 = vpack.c.bf16 %v232_v31, %v230_v30  ;;  %v231_v35 = vld [vmem:[%s3041_s3 + $0x70] sm:$0xff]  ;;  %v234_v36 = vld [vmem:[%s3041_s3 + $0x88] sm:$0xff]  ;;  %v236_v37 = vld [vmem:[%s3041_s3 + $0x98] sm:$0xff] }
   0xa   :  { %1296 = vmatprep.subr.bf16.mxu0 %v1295_v16  ;;  %v1317_v38 = vpack.c.bf16 %v231_v35, %v229_v34  ;;  %v24_v39 = vld [vmem:[%s3040_s0 + $0x8] sm:$0xff]  ;;  %v1319_v40 = vpack.c.bf16 %v236_v37, %v234_v36  ;;  %v233_v41 = vld [vmem:[%s3041_s3 + $0x80] sm:$0xff]  ;;  %v235_v42 = vld [vmem:[%s3041_s3 + $0x90] sm:$0xff]  ;;  %v124_v37 = vlaneseq }
   0xb   :  { %v238_v43 = vld [vmem:[%s3041_s3 + $0xa8] sm:$0xff]  ;;  %v240_v44 = vld [vmem:[%s3041_s3 + $0xb8] sm:$0xff]  ;;  %v1321_v45 = vpack.c.bf16 %v235_v42, %v233_v41  ;;  %v237_v47 = vld [vmem:[%s3041_s3 + $0xa0] sm:$0xff] }
   0xc   :  { %1310 = vmatpush1.bf16.msra.mxu1 %v1309_v25  ;;  %v1323_v46 = vpack.c.bf16 %v240_v44, %v238_v43  ;;  %v239_v48 = vld [vmem:[%s3041_s3 + $0xb0] sm:$0xff]  ;;  %v242_v49 = vld [vmem:[%s3041_s3 + $0xc8] sm:$0xff]  ;;  %v244_v50 = vld [vmem:[%s3041_s3 + $0xd8] sm:$0xff]  ;;  %vm126_vm1 = vcmp.lt.s32.totalorder %v124_v37, 256  ;;  %v1724_v43 = vmov 0.0  }
   0xd   :  { %1298 = vmatpush3.bf16.msra.mxu0 %v1295_v16  ;;  %1312 = vmatprep.subr.bf16.mxu1 %v1311_v26  ;;  %v1325_v51 = vpack.c.bf16 %v239_v48, %v237_v47  ;;  %v1327_v52 = vpack.c.bf16 %v244_v50, %v242_v49  ;;  %v241_v53 = vld [vmem:[%s3041_s3 + $0xc0] sm:$0xff]  ;;  %v243_v54 = vld [vmem:[%s3041_s3 + $0xd0] sm:$0xff]  ;;  %v246_v55 = vld [vmem:[%s3041_s3 + $0xe8] sm:$0xff]  ;;  %128 = vst.msk [vmem:[#allocation2] ss:$8 sm:$0x3] %vm126_vm1, %v1724_v43 }
   0xe   :  { %1300 = vmatprep.subr.bf16.mxu0 %v1299_v29  ;;  %v248_v56 = vld [vmem:[%s3041_s3 + $0xf8] sm:$0xff]  ;;  %v1329_v57 = vpack.c.bf16 %v243_v54, %v241_v53  ;;  %v245_v59 = vld [vmem:[%s3041_s3 + $0xe0] sm:$0xff]  ;;  %v247_v60 = vld [vmem:[%s3041_s3 + $0xf0] sm:$0xff]  ;;  %131 = vst.msk [vmem:[#allocation2 + $0x11] ss:$8 sm:$0x3] %vm126_vm1, %v1724_v43 }
   0xf   :  { %v1331_v58 = vpack.c.bf16 %v248_v56, %v246_v55  ;;  %v250_v61 = vld [vmem:[%s3041_s3 + $0x108] sm:$0xff]  ;;  %v252_v62 = vld [vmem:[%s3041_s3 + $0x118] sm:$0xff]  ;;  %v1333_v63 = vpack.c.bf16 %v247_v60, %v245_v59  ;;  %v249_v1 = vld [vmem:[%s3041_s3 + $0x100] sm:$0xff]  ;;  %144 = vst.msk [vmem:[#allocation2 + $0x12] ss:$8 sm:$0x3] %vm126_vm1, %v1724_v43 }
  0x10   :  { %1314 = vmatpush1.bf16.msra.mxu1 %v1313_v32  ;;  %v1335_v0 = vpack.c.bf16 %v252_v62, %v250_v61  ;;  %v251_v2 = vld [vmem:[%s3041_s3 + $0x110] sm:$0xff]  ;;  %v254_v3 = vld [vmem:[%s3041_s3 + $0x128] sm:$0xff]  ;;  %v256_v4 = vld [vmem:[%s3041_s3 + $0x138] sm:$0xff]  ;;  %147 = vst.msk [vmem:[#allocation2 + $0x23] ss:$8 sm:$0x3] %vm126_vm1, %v1724_v43 }
  0x11   :  { %1302 = vmatpush3.bf16.msra.mxu0 %v1299_v29  ;;  %1316 = vmatprep.subr.bf16.mxu1 %v1315_v33  ;;  %v1337_v5 = vpack.c.bf16 %v251_v2, %v249_v1  ;;  %v1339_v6 = vpack.c.bf16 %v256_v4, %v254_v3  ;;  %v253_v7 = vld [vmem:[%s3041_s3 + $0x120] sm:$0xff]  ;;  %v255_v8 = vld [vmem:[%s3041_s3 + $0x130] sm:$0xff]  ;;  %v258_v9 = vld [vmem:[%s3041_s3 + $0x148] sm:$0xff]  ;;  %677 = vst.msk [vmem:[#allocation3] ss:$8 sm:$0x3] %vm126_vm1, %v1724_v43 }
  0x12   :  { %v260_v10 = vld [vmem:[%s3041_s3 + $0x158] sm:$0xff]  ;;  %v1341_v11 = vpack.c.bf16 %v255_v8, %v253_v7  ;;  %v257_v13 = vld [vmem:[%s3041_s3 + $0x140] sm:$0xff]  ;;  %v259_v14 = vld [vmem:[%s3041_s3 + $0x150] sm:$0xff]  ;;  %680 = vst.msk [vmem:[#allocation3 + $0x11] ss:$8 sm:$0x3] %vm126_vm1, %v1724_v43 }
  0x13   :  { %v1343_v12 = vpack.c.bf16 %v260_v10, %v258_v9  ;;  %v262_v15 = vld [vmem:[%s3041_s3 + $0x168] sm:$0xff]  ;;  %v264_v16 = vld [vmem:[%s3041_s3 + $0x178] sm:$0xff]  ;;  %v1345_v17 = vpack.c.bf16 %v259_v14, %v257_v13  ;;  %v261_v19 = vld [vmem:[%s3041_s3 + $0x160] sm:$0xff]  ;;  %693 = vst.msk [vmem:[#allocation3 + $0x12] ss:$8 sm:$0x3] %vm126_vm1, %v1724_v43 }
  0x14   :  { %1285 = vmatmul.mubr.msk.f32.vlgmr.msra.gmra.mrb[0].mxu0 %vm38_vm0, %v24_v39  ;;  %1318 = vmatpush1.bf16.msra.mxu1 %v1317_v38  ;;  %v1347_v18 = vpack.c.bf16 %v264_v16, %v262_v15  ;;  %v263_v20 = vld [vmem:[%s3041_s3 + $0x170] sm:$0xff]  ;;  %v266_v21 = vld [vmem:[%s3041_s3 + $0x188] sm:$0xff]  ;;  %v268_v22 = vld [vmem:[%s3041_s3 + $0x198] sm:$0xff]  ;;  %696 = vst.msk [vmem:[#allocation3 + $0x23] ss:$8 sm:$0x3] %vm126_vm1, %v1724_v43 }
  0x15   :  { %1320 = vmatprep.subr.bf16.mxu1 %v1319_v40  ;;  %v1349_v23 = vpack.c.bf16 %v263_v20, %v261_v19  ;;  %v1351_v24 = vpack.c.bf16 %v268_v22, %v266_v21  ;;  %v265_v25 = vld [vmem:[%s3041_s3 + $0x180] sm:$0xff]  ;;  %v267_v26 = vld [vmem:[%s3041_s3 + $0x190] sm:$0xff]  ;;  %v270_v28 = vld [vmem:[%s3041_s3 + $0x1a8] sm:$0xff] }
  0x16   :  { %v1353_v27 = vpack.c.bf16 %v267_v26, %v265_v25  ;;  %v272_v29 = vld [vmem:[%s3041_s3 + $0x1b8] sm:$0xff]  ;;  %v269_v31 = vld [vmem:[%s3041_s3 + $0x1a0] sm:$0xff]  ;;  %v271_v32 = vld [vmem:[%s3041_s3 + $0x1b0] sm:$0xff] }
  0x17   :  { %v1355_v30 = vpack.c.bf16 %v272_v29, %v270_v28  ;;  %v1357_v33 = vpack.c.bf16 %v271_v32, %v269_v31  ;;  %v274_v34 = vld [vmem:[%s3041_s3 + $0x1c8] sm:$0xff]  ;;  %v276_v35 = vld [vmem:[%s3041_s3 + $0x1d8] sm:$0xff]  ;;  %v122_v36 = vld [vmem:[%s3042_s1] sm:$0xff] }
  0x18   :  { %1322 = vmatpush1.bf16.msra.mxu1 %v1321_v45  ;;  %v1359_v38 = vpack.c.bf16 %v276_v35, %v274_v34  ;;  %v273_v39 = vld [vmem:[%s3041_s3 + $0x1c0] sm:$0xff]  ;;  %v275_v40 = vld [vmem:[%s3041_s3 + $0x1d0] sm:$0xff]  ;;  %v139_v41 = vrot.slane %v122_v36, 7  ;;  %v278_v44 = vld [vmem:[%s3041_s3 + $0x1e8] sm:$0xff] }
  0x19   :  { %1324 = vmatprep.subr.bf16.mxu1 %v1323_v46  ;;  %v1361_v42 = vpack.c.bf16 %v275_v40, %v273_v39  ;;  %v280_v45 = vld [vmem:[%s3041_s3 + $0x1f8] sm:$0xff]  ;;  %v277_v46 = vld [vmem:[%s3041_s3 + $0x1e0] sm:$0xff]  ;;  %v279_v48 = vld [vmem:[%s3041_s3 + $0x1f0] sm:$0xff] }
  0x1a   :  { %141 = vst [vmem:[#allocation2 + $0x8] sm:$0xfe] %v139_v41  ;;  %142 = vst [vmem:[#allocation2 + $0x18] sm:$0x1] %v139_v41  ;;  %v1363_v47 = vpack.c.bf16 %v280_v45, %v278_v44  ;;  %v282_v49 = vld [vmem:[%s3041_s3 + $0x208] sm:$0xff]  ;;  %v284_v50 = vld [vmem:[%s3041_s3 + $0x218] sm:$0xff] }
  0x1b   :  { %v123_v53 = vld [vmem:[%s3042_s1 + $0x8] sm:$0xff]  ;;  %v1253_v56 = vld [vmem:[%s3043_s5] ss:$0 sm:$0xff]  ;;  %v283_v2 = vld [vmem:[%s3041_s3 + $0x210] sm:$0xff] }
  0x1c   :  { %1326 = vmatpush1.bf16.msra.mxu1 %v1325_v51  ;;  %v1365_v51 = vpack.c.bf16 %v279_v48, %v277_v46  ;;  %v155_v54 = vrot.slane %v123_v53, 5  ;;  %v281_v1 = vld [vmem:[%s3041_s3 + $0x200] sm:$0xff]  ;;  %v286_v3 = vld [vmem:[%s3041_s3 + $0x228] sm:$0xff]  ;;  %v288_v4 = vld [vmem:[%s3041_s3 + $0x238] sm:$0xff] }
  0x1d   :  { %1328 = vmatprep.subr.bf16.mxu1 %v1327_v52  ;;  %v1367_v52 = vpack.c.bf16 %v284_v50, %v282_v49  ;;  %v1371_v8 = vpack.c.bf16 %v288_v4, %v286_v3  ;;  %v287_v9 = vld [vmem:[%s3041_s3 + $0x230] sm:$0xff]  ;;  %v290_v10 = vld [vmem:[%s3041_s3 + $0x248] sm:$0xff]  ;;  %v293_v26 = vld [vmem:[%s3041_s3 + $0x260] sm:$0xff] }
  0x1e   :  { %157 = vst [vmem:[#allocation2 + $0x18] sm:$0xf8] %v155_v54  ;;  %158 = vst [vmem:[#allocation2 + $0x28] sm:$0x7] %v155_v54  ;;  %v291_v19 = vld [vmem:[%s3041_s3 + $0x250] sm:$0xff]  ;;  %v294_v22 = vld [vmem:[%s3041_s3 + $0x268] sm:$0xff] }
  0x1f   :  { %v300_v31 = vld [vmem:[%s3041_s3 + $0x298] sm:$0xff]  ;;  %v297_v32 = vld [vmem:[%s3041_s3 + $0x280] sm:$0xff]  ;;  %v302_v35 = vld [vmem:[%s3041_s3 + $0x2a8] sm:$0xff] }
  0x20   :  { %1330 = vmatpush1.bf16.msra.mxu1 %v1329_v57  ;;  %v304_v36 = vld [vmem:[%s3041_s3 + $0x2b8] sm:$0xff]  ;;  %v773_v40 = vld [vmem:[%s3044_s4] sm:$0xff]  ;;  %v775_v43 = vld [vmem:[%s3044_s4 + $0x10] sm:$0xff] }
  0x21   :  { %1332 = vmatprep.subr.bf16.mxu1 %v1331_v58  ;;  %v160_v55 = vld [vmem:[#allocation2 + $0x8] sm:$0xff]  ;;  %v776_v39 = vld [vmem:[%s3044_s4 + $0x18] sm:$0xff]  ;;  %v1497_v46 = vpack.c.bf16 %v775_v43, %v773_v40  ;;  %v777_v48 = vld [vmem:[%s3044_s4 + $0x20] sm:$0xff] }
  0x22   :  { %486 = vmatprep.mubr.f32.mxu1 %v160_v55  ;;  %v166_v13 = vld [vmem:[#allocation2 + $0x8] sm:$0xfe]  ;;  %v780_v45 = vld [vmem:[%s3044_s4 + $0x38] sm:$0xff]  ;;  %v779_v49 = vld [vmem:[%s3044_s4 + $0x30] sm:$0xff] }
  0x23   :  { %v183_v20 = vrot.slane %v166_v13, 1  ;;  %v778_v44 = vld [vmem:[%s3044_s4 + $0x28] sm:$0xff]  ;;  %v301_v53 = vld [vmem:[%s3041_s3 + $0x2a0] sm:$0xff]  ;;  %v303_v54 = vld [vmem:[%s3041_s3 + $0x2b0] sm:$0xff]  ;;  %v1501_v55 = vpack.c.bf16 %v779_v49, %v777_v48 }
  0x24   :  { %1334 = vmatpush1.bf16.msra.mxu1 %v1333_v63  ;;  %v782_v50 = vld [vmem:[%s3044_s4 + $0x48] sm:$0xff]  ;;  %v799_v48 = vld [vmem:[%s3044_s4 + $0xd0] sm:$0xff]  ;;  %v324_v49 = vld [vmem:[%s3041_s3 + $0x358] sm:$0xff] }
  0x25   :  { %1336 = vmatprep.subr.bf16.mxu1 %v1335_v0  ;;  %v2015_v7 = vld [vmem:[#allocation2 + $0x18] sm:$0xff]  ;;  %v164_v16 = vld [vmem:[#allocation2 + $0x28] sm:$0x3] }
  0x26   :  { %v184_v15 = vrot.slane %v2015_v7, 1 }
  0x28   :  { %1338 = vmatpush1.bf16.msra.mxu1 %v1337_v5  ;;  %v1369_v5 = vpack.c.bf16 %v283_v2, %v281_v1  ;;  %v185_v28 = vsel %vm179_vm2, %v183_v20, %v184_v15  ;;  %v305_v1 = vld [vmem:[%s3041_s3 + $0x2c0] sm:$0xff]  ;;  %v307_v2 = vld [vmem:[%s3041_s3 + $0x2d0] sm:$0xff] }
  0x29   :  { %1340 = vmatprep.subr.bf16.mxu1 %v1339_v6  ;;  %v285_v6 = vld [vmem:[%s3041_s3 + $0x220] sm:$0xff]  ;;  %v1393_v13 = vpack.c.bf16 %v307_v2, %v305_v1  ;;  %v327_v2 = vld [vmem:[%s3041_s3 + $0x370] sm:$0xff] }
  0x2a   :  { %v1373_v14 = vpack.c.bf16 %v287_v9, %v285_v6  ;;  %v787_v9 = vld [vmem:[%s3044_s4 + $0x70] sm:$0xff]  ;;  %v325_v1 = vld [vmem:[%s3041_s3 + $0x360] sm:$0xff] }
  0x2c   :  { %1342 = vmatpush1.bf16.msra.mxu1 %v1341_v11 }
  0x2d   :  { %1344 = vmatprep.subr.bf16.mxu1 %v1343_v12  ;;  %v292_v12 = vld [vmem:[%s3041_s3 + $0x258] sm:$0xff] }
  0x30   :  { %1346 = vmatpush1.bf16.msra.mxu1 %v1345_v17  ;;  %v1375_v17 = vpack.c.bf16 %v292_v12, %v290_v10  ;;  %v312_v10 = vld [vmem:[%s3041_s3 + $0x2f8] sm:$0xff] }
  0x31   :  { %1348 = vmatprep.subr.bf16.mxu1 %v1347_v18  ;;  %v289_v18 = vld [vmem:[%s3041_s3 + $0x240] sm:$0xff]  ;;  %v792_v12 = vld [vmem:[%s3044_s4 + $0x98] sm:$0xff] }
  0x34   :  { %1350 = vmatpush1.bf16.msra.mxu1 %v1349_v23  ;;  %v296_v23 = vld [vmem:[%s3041_s3 + $0x278] sm:$0xff] }
  0x35   :  { %1352 = vmatprep.subr.bf16.mxu1 %v1351_v24  ;;  %v1377_v24 = vpack.c.bf16 %v291_v19, %v289_v18  ;;  %v1379_v25 = vpack.c.bf16 %v296_v23, %v294_v22  ;;  %v314_v19 = vld [vmem:[%s3041_s3 + $0x308] sm:$0xff]  ;;  %v789_v22 = vld [vmem:[%s3044_s4 + $0x80] sm:$0xff]  ;;  %v791_v23 = vld [vmem:[%s3044_s4 + $0x90] sm:$0xff] }
  0x38   :  { %1354 = vmatpush1.bf16.msra.mxu1 %v1353_v27  ;;  %v295_v27 = vld [vmem:[%s3041_s3 + $0x270] sm:$0xff] }
  0x39   :  { %1356 = vmatprep.subr.bf16.mxu1 %v1355_v30  ;;  %v298_v30 = vld [vmem:[%s3041_s3 + $0x288] sm:$0xff]  ;;  %v1381_v34 = vpack.c.bf16 %v295_v27, %v293_v26  ;;  %v796_v26 = vld [vmem:[%s3044_s4 + $0xb8] sm:$0xff] }
  0x3a   :  { %v1383_v41 = vpack.c.bf16 %v300_v31, %v298_v30  ;;  %v1513_v30 = vpack.c.bf16 %v791_v23, %v789_v22  ;;  %v809_v22 = vld [vmem:[%s3044_s4 + $0x120] sm:$0xff]  ;;  %v811_v23 = vld [vmem:[%s3044_s4 + $0x130] sm:$0xff] }
  0x3c   :  { %1358 = vmatpush1.bf16.msra.mxu1 %v1357_v33  ;;  %v299_v33 = vld [vmem:[%s3041_s3 + $0x290] sm:$0xff] }
  0x3d   :  { %1360 = vmatprep.subr.bf16.mxu1 %v1359_v38  ;;  %v774_v38 = vld [vmem:[%s3044_s4 + $0x8] sm:$0xff] }
  0x40   :  { %1362 = vmatpush1.bf16.msra.mxu1 %v1361_v42  ;;  %v1495_v42 = vpack.c.bf16 %v776_v39, %v774_v38  ;;  %v798_v38 = vld [vmem:[%s3044_s4 + $0xc8] sm:$0xff]  ;;  %v800_v39 = vld [vmem:[%s3044_s4 + $0xd8] sm:$0xff] }
  0x41   :  { %1364 = vmatprep.subr.bf16.mxu1 %v1363_v47  ;;  %v1499_v47 = vpack.c.bf16 %v780_v45, %v778_v44  ;;  %v322_v45 = vld [vmem:[%s3041_s3 + $0x348] sm:$0xff] }
  0x42   :  { %1496 = vmatprep.subr.bf16.mxu0 %v1495_v42  ;;  %v319_v42 = vld [vmem:[%s3041_s3 + $0x330] sm:$0xff] }
  0x43   :  { %1498 = vmatpush1.bf16.msra.mxu0 %v1497_v46  ;;  %v1519_v46 = vpack.c.bf16 %v800_v39, %v798_v38  ;;  %v818_v38 = vld [vmem:[%s3044_s4 + $0x168] sm:$0xff]  ;;  %v820_v39 = vld [vmem:[%s3044_s4 + $0x178] sm:$0xff] }
  0x44   :  { %1366 = vmatpush1.bf16.msra.mxu1 %v1365_v51  ;;  %v784_v51 = vld [vmem:[%s3044_s4 + $0x58] sm:$0xff]  ;;  %1500 = vmatprep.subr.bf16.mxu0 %v1499_v47  ;;  %v797_v47 = vld [vmem:[%s3044_s4 + $0xc0] sm:$0xff] }
  0x45   :  { %1368 = vmatprep.subr.bf16.mxu1 %v1367_v52  ;;  %v1385_v52 = vpack.c.bf16 %v299_v33, %v297_v32  ;;  %v318_v32 = vld [vmem:[%s3041_s3 + $0x328] sm:$0xff] }
  0x47   :  { %1502 = vmatpush1.bf16.msra.mxu0 %v1501_v55  ;;  %v1521_v55 = vpack.c.bf16 %v799_v48, %v797_v47  ;;  %v819_v47 = vld [vmem:[%s3044_s4 + $0x170] sm:$0xff]  ;;  %v342_v48 = vld [vmem:[%s3041_s3 + $0x3e8] sm:$0xff] }
  0xe7   :  { %v1286_v57 = vpop.f32.mrb[0].mxu0 }
  0xe8   :  { %v117_v58 = vadd.f32 %v1286_v57, %v1253_v56  ;;  %v111_v59 = vpop.f32.mrb[1].mxu0  ;;  %v306_v57 = vld [vmem:[%s3041_s3 + $0x2c8] sm:$0xff] }
  0xe9   :  { %v112_v60 = vadd.f32 %v1253_v56, %v111_v59  ;;  %v1387_v56 = vpack.c.bf16 %v304_v36, %v302_v35  ;;  %v781_v59 = vld [vmem:[%s3044_s4 + $0x40] sm:$0xff]  ;;  %v795_v35 = vld [vmem:[%s3044_s4 + $0xb0] sm:$0xff]  ;;  %v320_v36 = vld [vmem:[%s3041_s3 + $0x338] sm:$0xff] }
  0xea   :  { %v121_v61 = vmax.f32 %v117_v58, 0.0  ;;  %v1503_v58 = vpack.c.bf16 %v784_v51, %v782_v50  ;;  %v1403_v44 = vpack.c.bf16 %v320_v36, %v318_v32  ;;  %v802_v50 = vld [vmem:[%s3044_s4 + $0xe8] sm:$0xff]  ;;  %v804_v51 = vld [vmem:[%s3044_s4 + $0xf8] sm:$0xff] }
  0xeb   :  { %v120_v62 = vmax.f32 %v112_v60, 0.0  ;;  %v783_v60 = vld [vmem:[%s3044_s4 + $0x50] sm:$0xff]  ;;  %v338_v32 = vld [vmem:[%s3041_s3 + $0x3c8] sm:$0xff]  ;;  %v340_v36 = vld [vmem:[%s3041_s3 + $0x3d8] sm:$0xff] }
  0xec   :  { %v150_v63 = vrot.slane %v121_v61, 5  ;;  %v308_v61 = vld [vmem:[%s3041_s3 + $0x2d8] sm:$0xff]  ;;  %v1505_v3 = vpack.c.bf16 %v783_v60, %v781_v59  ;;  %1504 = vmatprep.subr.bf16.mxu0 %v1503_v58  ;;  %v1523_v58 = vpack.c.bf16 %v804_v51, %v802_v50  ;;  %v801_v59 = vld [vmem:[%s3044_s4 + $0xe0] sm:$0xff]  ;;  %v803_v60 = vld [vmem:[%s3044_s4 + $0xf0] sm:$0xff] }
  0xed   :  { %v134_v0 = vrot.slane %v120_v62, 7  ;;  %v786_v62 = vld [vmem:[%s3044_s4 + $0x68] sm:$0xff]  ;;  %v1391_v4 = vpack.c.bf16 %v308_v61, %v306_v57  ;;  %v328_v61 = vld [vmem:[%s3041_s3 + $0x378] sm:$0xff] }
  0xee   :  { %152 = vst [vmem:[#allocation2 + $0x10] sm:$0xf8] %v150_v63  ;;  %153 = vst [vmem:[#allocation2 + $0x20] sm:$0x7] %v150_v63  ;;  %v788_v63 = vld [vmem:[%s3044_s4 + $0x78] sm:$0xff]  ;;  %1506 = vmatpush1.bf16.msra.mxu0 %v1505_v3  ;;  %v326_v57 = vld [vmem:[%s3041_s3 + $0x368] sm:$0xff]  ;;  %v1525_v3 = vpack.c.bf16 %v803_v60, %v801_v59 }
  0xef   :  { %136 = vst [vmem:[#allocation2] sm:$0xfe] %v134_v0  ;;  %137 = vst [vmem:[#allocation2 + $0x10] sm:$0x1] %v134_v0  ;;  %v1389_v0 = vpack.c.bf16 %v303_v54, %v301_v53  ;;  %v1507_v6 = vpack.c.bf16 %v788_v63, %v786_v62  ;;  %v321_v53 = vld [vmem:[%s3041_s3 + $0x340] sm:$0xff]  ;;  %v323_v54 = vld [vmem:[%s3041_s3 + $0x350] sm:$0xff] }
  0xf0   :  { %v806_v62 = vld [vmem:[%s3044_s4 + $0x108] sm:$0xff]  ;;  %v808_v63 = vld [vmem:[%s3044_s4 + $0x118] sm:$0xff] }
  0xf1   :  { %1508 = vmatprep.subr.bf16.mxu0 %v1507_v6  ;;  %v1527_v6 = vpack.c.bf16 %v808_v63, %v806_v62  ;;  %v347_v62 = vld [vmem:[%s3041_s3 + $0x410] sm:$0xff] }
  0xf5   :  { %v163_v29 = vld [vmem:[#allocation2 + $0x20] sm:$0x3] }
  0xf6   :  { %v159_v11 = vld [vmem:[#allocation2] sm:$0xff]  ;;  %v2034_v21 = vld [vmem:[#allocation2 + $0x10] sm:$0xff] }
  0xf7   :  { %487 = vmatmul.mubr.f32.vlgmr.msra.gmra.mrb[0].mxu1 %v159_v11  ;;  %v790_v11 = vld [vmem:[%s3044_s4 + $0x88] sm:$0xff] }
  0xf8   :  { %1370 = vmatpush1.bf16.msra.mxu1 %v1369_v5  ;;  %492 = vmatprep.mubr.f32.mxu1 %v2015_v7  ;;  %v310_v5 = vld [vmem:[%s3041_s3 + $0x2e8] sm:$0xff]  ;;  %v1511_v20 = vpack.c.bf16 %v792_v12, %v790_v11  ;;  %v812_v12 = vld [vmem:[%s3044_s4 + $0x138] sm:$0xff] }
  0xf9   :  { %1372 = vmatprep.subr.bf16.mxu1 %v1371_v8  ;;  %v785_v8 = vld [vmem:[%s3044_s4 + $0x60] sm:$0xff]  ;;  %v1395_v18 = vpack.c.bf16 %v312_v10, %v310_v5  ;;  %v330_v5 = vld [vmem:[%s3041_s3 + $0x388] sm:$0xff]  ;;  %v332_v10 = vld [vmem:[%s3041_s3 + $0x398] sm:$0xff] }
  0xfa   :  { %v810_v11 = vld [vmem:[%s3044_s4 + $0x128] sm:$0xff] }
  0xfb   :  { %493 = vmatmul.mubr.f32.gmra.mrb[2].mxu1 %v2034_v21 }
  0xfc   :  { %1374 = vmatpush1.bf16.msra.mxu1 %v1373_v14  ;;  %498 = vmatprep.mubr.f32.mxu1 %v164_v16  ;;  %v309_v14 = vld [vmem:[%s3041_s3 + $0x2e0] sm:$0xff]  ;;  %v311_v16 = vld [vmem:[%s3041_s3 + $0x2f0] sm:$0xff] }
  0xfd   :  { %1376 = vmatprep.subr.bf16.mxu1 %v1375_v17  ;;  %v1509_v17 = vpack.c.bf16 %v787_v9, %v785_v8  ;;  %v1397_v27 = vpack.c.bf16 %v311_v16, %v309_v14  ;;  %v805_v8 = vld [vmem:[%s3044_s4 + $0x100] sm:$0xff]  ;;  %v807_v9 = vld [vmem:[%s3044_s4 + $0x110] sm:$0xff] }
  0xfe   :  { %v329_v14 = vld [vmem:[%s3041_s3 + $0x380] sm:$0xff]  ;;  %v331_v16 = vld [vmem:[%s3041_s3 + $0x390] sm:$0xff] }
  0xff   :  { %499 = vmatmul.mubr.f32.gmra.mrb[4].mxu1 %v163_v29  ;;  %v315_v29 = vld [vmem:[%s3041_s3 + $0x310] sm:$0xff]  ;;  %1510 = vmatpush1.bf16.msra.mxu0 %v1509_v17  ;;  %v1529_v17 = vpack.c.bf16 %v807_v9, %v805_v8  ;;  %v349_v9 = vld [vmem:[%s3041_s3 + $0x420] sm:$0xff] }
 0x100   :  { %1378 = vmatpush1.bf16.msra.mxu1 %v1377_v24  ;;  %569 = vmatprep.mubr.f32.mxu1 %v185_v28  ;;  %v316_v24 = vld [vmem:[%s3041_s3 + $0x318] sm:$0xff]  ;;  %v313_v28 = vld [vmem:[%s3041_s3 + $0x300] sm:$0xff] }
 0x101   :  { %1380 = vmatprep.subr.bf16.mxu1 %v1379_v25  ;;  %v794_v25 = vld [vmem:[%s3044_s4 + $0xa8] sm:$0xff]  ;;  %v1399_v31 = vpack.c.bf16 %v316_v24, %v314_v19  ;;  %1512 = vmatprep.subr.bf16.mxu0 %v1511_v20  ;;  %v1401_v40 = vpack.c.bf16 %v315_v29, %v313_v28  ;;  %v1531_v20 = vpack.c.bf16 %v812_v12, %v810_v11  ;;  %v336_v24 = vld [vmem:[%s3041_s3 + $0x3b8] sm:$0xff]  ;;  %v333_v28 = vld [vmem:[%s3041_s3 + $0x3a0] sm:$0xff] }
 0x102   :  { %v1515_v33 = vpack.c.bf16 %v796_v26, %v794_v25  ;;  %v334_v19 = vld [vmem:[%s3041_s3 + $0x3a8] sm:$0xff]  ;;  %v816_v26 = vld [vmem:[%s3044_s4 + $0x158] sm:$0xff]  ;;  %v335_v29 = vld [vmem:[%s3041_s3 + $0x3b0] sm:$0xff] }
 0x103   :  { %1514 = vmatpush1.bf16.msra.mxu0 %v1513_v30  ;;  %v814_v25 = vld [vmem:[%s3044_s4 + $0x148] sm:$0xff]  ;;  %v1533_v30 = vpack.c.bf16 %v811_v23, %v809_v22 }
 0x104   :  { %1382 = vmatpush1.bf16.msra.mxu1 %v1381_v34  ;;  %v793_v34 = vld [vmem:[%s3044_s4 + $0xa0] sm:$0xff]  ;;  %1516 = vmatprep.subr.bf16.mxu0 %v1515_v33  ;;  %v1535_v33 = vpack.c.bf16 %v816_v26, %v814_v25  ;;  %v360_v25 = vld [vmem:[%s3041_s3 + $0x478] sm:$0xff] }
 0x105   :  { %1384 = vmatprep.subr.bf16.mxu1 %v1383_v41  ;;  %v317_v41 = vld [vmem:[%s3041_s3 + $0x320] sm:$0xff]  ;;  %v1517_v43 = vpack.c.bf16 %v795_v35, %v793_v34  ;;  %v815_v35 = vld [vmem:[%s3044_s4 + $0x150] sm:$0xff] }
 0x106   :  { %v813_v34 = vld [vmem:[%s3044_s4 + $0x140] sm:$0xff] }
 0x107   :  { %1518 = vmatpush1.bf16.msra.mxu0 %v1517_v43  ;;  %v1423_v43 = vpack.c.bf16 %v340_v36, %v338_v32  ;;  %v364_v32 = vld [vmem:[%s3041_s3 + $0x498] sm:$0xff]  ;;  %v363_v36 = vld [vmem:[%s3041_s3 + $0x490] sm:$0xff] }
 0x108   :  { %1386 = vmatpush1.bf16.msra.mxu1 %v1385_v52  ;;  %v1405_v52 = vpack.c.bf16 %v319_v42, %v317_v41  ;;  %1520 = vmatprep.subr.bf16.mxu0 %v1519_v46  ;;  %v337_v41 = vld [vmem:[%s3041_s3 + $0x3c0] sm:$0xff]  ;;  %v1537_v42 = vpack.c.bf16 %v815_v35, %v813_v34 }
 0x109   :  { %1388 = vmatprep.subr.bf16.mxu1 %v1387_v56  ;;  %v1407_v56 = vpack.c.bf16 %v324_v49, %v322_v45  ;;  %v1539_v45 = vpack.c.bf16 %v820_v39, %v818_v38  ;;  %v817_v46 = vld [vmem:[%s3044_s4 + $0x160] sm:$0xff]  ;;  %v344_v49 = vld [vmem:[%s3041_s3 + $0x3f8] sm:$0xff]  ;;  %v366_v38 = vld [vmem:[%s3041_s3 + $0x4a8] sm:$0xff] }
 0x10a   :  { %v1541_v51 = vpack.c.bf16 %v819_v47, %v817_v46  ;;  %v361_v35 = vld [vmem:[%s3041_s3 + $0x480] sm:$0xff]  ;;  %v368_v39 = vld [vmem:[%s3041_s3 + $0x4b8] sm:$0xff] }
 0x10b   :  { %1522 = vmatpush1.bf16.msra.mxu0 %v1521_v55  ;;  %v346_v55 = vld [vmem:[%s3041_s3 + $0x408] sm:$0xff] }
 0x10c   :  { %1390 = vmatpush1.bf16.msra.mxu1 %v1389_v0  ;;  %v1409_v0 = vpack.c.bf16 %v323_v54, %v321_v53  ;;  %1524 = vmatprep.subr.bf16.mxu0 %v1523_v58  ;;  %v341_v53 = vld [vmem:[%s3041_s3 + $0x3e0] sm:$0xff]  ;;  %v343_v54 = vld [vmem:[%s3041_s3 + $0x3f0] sm:$0xff] }
 0x10d   :  { %1392 = vmatprep.subr.bf16.mxu1 %v1391_v4  ;;  %v1411_v4 = vpack.c.bf16 %v328_v61, %v326_v57  ;;  %v168_v57 = vld [vmem:[#allocation2 + $0x28] sm:$0x7]  ;;  %v165_v58 = vld [vmem:[#allocation2] sm:$0xfe]  ;;  %v1429_v59 = vpack.c.bf16 %v343_v54, %v341_v53 }
 0x10e   :  { %v345_v61 = vld [vmem:[%s3041_s3 + $0x400] sm:$0xff]  ;;  %v188_v63 = vrot.slane %v168_v57, 1  ;;  %v380_v57 = vld [vmem:[%s3041_s3 + $0x518] sm:$0xff] }
 0x10f   :  { %1526 = vmatpush1.bf16.msra.mxu0 %v1525_v3  ;;  %v352_v3 = vld [vmem:[%s3041_s3 + $0x438] sm:$0xff]  ;;  %v373_v54 = vld [vmem:[%s3041_s3 + $0x4e0] sm:$0xff] }
 0x110   :  { %1394 = vmatpush1.bf16.msra.mxu1 %v1393_v13  ;;  %v1413_v13 = vpack.c.bf16 %v327_v2, %v325_v1  ;;  %1528 = vmatprep.subr.bf16.mxu0 %v1527_v6  ;;  %v180_v1 = vrot.slane %v165_v58, 1  ;;  %v350_v2 = vld [vmem:[%s3041_s3 + $0x428] sm:$0xff]  ;;  %v189_v6 = vsel %vm179_vm2, %v184_v15, %v188_v63  ;;  %v356_v15 = vld [vmem:[%s3041_s3 + $0x458] sm:$0xff] }
 0x111   :  { %1396 = vmatprep.subr.bf16.mxu1 %v1395_v18  ;;  %v1415_v18 = vpack.c.bf16 %v332_v10, %v330_v5  ;;  %v1433_v5 = vpack.c.bf16 %v347_v62, %v345_v61  ;;  %v1435_v8 = vpack.c.bf16 %v352_v3, %v350_v2  ;;  %v351_v10 = vld [vmem:[%s3041_s3 + $0x430] sm:$0xff]  ;;  %v382_v62 = vld [vmem:[%s3041_s3 + $0x528] sm:$0xff]  ;;  %v381_v2 = vld [vmem:[%s3041_s3 + $0x520] sm:$0xff] }
 0x112   :  { %v379_v61 = vld [vmem:[%s3041_s3 + $0x510] sm:$0xff] }
 0x113   :  { %1530 = vmatpush1.bf16.msra.mxu0 %v1529_v17  ;;  %v205_v17 = vrot.slane %v2015_v7, 2  ;;  %v383_v3 = vld [vmem:[%s3041_s3 + $0x530] sm:$0xff]  ;;  %v824_v7 = vld [vmem:[%s3044_s4 + $0x198] sm:$0xff] }
 0x114   :  { %1398 = vmatpush1.bf16.msra.mxu1 %v1397_v27  ;;  %v1417_v27 = vpack.c.bf16 %v331_v16, %v329_v14  ;;  %1532 = vmatprep.subr.bf16.mxu0 %v1531_v20  ;;  %v170_v14 = vld [vmem:[#allocation2 + $0x8] sm:$0xfc]  ;;  %v1437_v16 = vpack.c.bf16 %v351_v10, %v349_v9  ;;  %v355_v20 = vld [vmem:[%s3041_s3 + $0x450] sm:$0xff]  ;;  %v385_v9 = vld [vmem:[%s3041_s3 + $0x540] sm:$0xff] }
 0x115   :  { %1400 = vmatprep.subr.bf16.mxu1 %v1399_v31  ;;  %v1419_v31 = vpack.c.bf16 %v336_v24, %v334_v19  ;;  %v353_v19 = vld [vmem:[%s3041_s3 + $0x440] sm:$0xff]  ;;  %v204_v22 = vrot.slane %v170_v14, 2  ;;  %v358_v24 = vld [vmem:[%s3041_s3 + $0x468] sm:$0xff]  ;;  %v387_v10 = vld [vmem:[%s3041_s3 + $0x550] sm:$0xff] }
 0x116   :  { %v1441_v26 = vpack.c.bf16 %v355_v20, %v353_v19  ;;  %v389_v14 = vld [vmem:[%s3041_s3 + $0x560] sm:$0xff]  ;;  %v396_v19 = vld [vmem:[%s3041_s3 + $0x598] sm:$0xff] }
 0x117   :  { %1534 = vmatpush1.bf16.msra.mxu0 %v1533_v30  ;;  %v206_v30 = vsel %vm200_vm3, %v204_v22, %v205_v17 }
 0x118   :  { %1402 = vmatpush1.bf16.msra.mxu1 %v1401_v40  ;;  %v1421_v40 = vpack.c.bf16 %v335_v29, %v333_v28  ;;  %1536 = vmatprep.subr.bf16.mxu0 %v1535_v33  ;;  %v357_v28 = vld [vmem:[%s3041_s3 + $0x460] sm:$0xff]  ;;  %v359_v29 = vld [vmem:[%s3041_s3 + $0x470] sm:$0xff] }
 0x119   :  { %1404 = vmatprep.subr.bf16.mxu1 %v1403_v44  ;;  %v339_v44 = vld [vmem:[%s3041_s3 + $0x3d0] sm:$0xff]  ;;  %v1445_v33 = vpack.c.bf16 %v359_v29, %v357_v28  ;;  %v397_v29 = vld [vmem:[%s3041_s3 + $0x5a0] sm:$0xff] }
 0x11a   :  { %v1425_v50 = vpack.c.bf16 %v339_v44, %v337_v41  ;;  %v1451_v41 = vpack.c.bf16 %v368_v39, %v366_v38  ;;  %v370_v44 = vld [vmem:[%s3041_s3 + $0x4c8] sm:$0xff]  ;;  %v408_v39 = vld [vmem:[%s3041_s3 + $0x5f8] sm:$0xff] }
 0x11b   :  { %1538 = vmatpush1.bf16.msra.mxu0 %v1537_v42  ;;  %v365_v42 = vld [vmem:[%s3041_s3 + $0x4a0] sm:$0xff]  ;;  %v406_v38 = vld [vmem:[%s3041_s3 + $0x5e8] sm:$0xff] }
 0x11c   :  { %1406 = vmatpush1.bf16.msra.mxu1 %v1405_v52  ;;  %v1427_v52 = vpack.c.bf16 %v344_v49, %v342_v48  ;;  %1540 = vmatprep.subr.bf16.mxu0 %v1539_v45  ;;  %v372_v45 = vld [vmem:[%s3041_s3 + $0x4d8] sm:$0xff]  ;;  %v369_v48 = vld [vmem:[%s3041_s3 + $0x4c0] sm:$0xff]  ;;  %v371_v49 = vld [vmem:[%s3041_s3 + $0x4d0] sm:$0xff] }
 0x11d   :  { %1408 = vmatprep.subr.bf16.mxu1 %v1407_v56  ;;  %v348_v56 = vld [vmem:[%s3041_s3 + $0x418] sm:$0xff]  ;;  %v1455_v47 = vpack.c.bf16 %v372_v45, %v370_v44  ;;  %v172_v44 = vld [vmem:[#allocation2 + $0x28] sm:$0xf]  ;;  %v169_v45 = vld [vmem:[#allocation2] sm:$0xfc] }
 0x11e   :  { %v1431_v60 = vpack.c.bf16 %v348_v56, %v346_v55  ;;  %v375_v55 = vld [vmem:[%s3041_s3 + $0x4f0] sm:$0xff]  ;;  %v378_v56 = vld [vmem:[%s3041_s3 + $0x508] sm:$0xff] }
 0x11f   :  { %1542 = vmatpush1.bf16.msra.mxu0 %v1541_v51  ;;  %v376_v51 = vld [vmem:[%s3041_s3 + $0x4f8] sm:$0xff]  ;;  %v1461_v58 = vpack.c.bf16 %v375_v55, %v373_v54 }
 0x120   :  { %1410 = vmatpush1.bf16.msra.mxu1 %v1409_v0  ;;  %v181_v0 = vrot.slane %v2034_v21, 1 }
 0x121   :  { %1412 = vmatprep.subr.bf16.mxu1 %v1411_v4  ;;  %v167_v4 = vld [vmem:[#allocation2 + $0x20] sm:$0x7] }
 0x122   :  { %v182_v11 = vsel %vm179_vm2, %v180_v1, %v181_v0  ;;  %v186_v12 = vrot.slane %v167_v4, 1  ;;  %v386_v4 = vld [vmem:[%s3041_s3 + $0x548] sm:$0xff] }
 0x124   :  { %1414 = vmatpush1.bf16.msra.mxu1 %v1413_v13  ;;  %v354_v13 = vld [vmem:[%s3041_s3 + $0x448] sm:$0xff]  ;;  %v187_v23 = vsel %vm179_vm2, %v181_v0, %v186_v12 }
 0x125   :  { %1416 = vmatprep.subr.bf16.mxu1 %v1415_v18  ;;  %v1439_v18 = vpack.c.bf16 %v356_v15, %v354_v13  ;;  %v1473_v13 = vpack.c.bf16 %v387_v10, %v385_v9  ;;  %v833_v10 = vld [vmem:[%s3044_s4 + $0x1e0] sm:$0xff] }
 0x128   :  { %1418 = vmatpush1.bf16.msra.mxu1 %v1417_v27  ;;  %v1443_v27 = vpack.c.bf16 %v360_v25, %v358_v24  ;;  %v395_v24 = vld [vmem:[%s3041_s3 + $0x590] sm:$0xff]  ;;  %v398_v25 = vld [vmem:[%s3041_s3 + $0x5a8] sm:$0xff] }
 0x129   :  { %1420 = vmatprep.subr.bf16.mxu1 %v1419_v31  ;;  %v362_v31 = vld [vmem:[%s3041_s3 + $0x488] sm:$0xff] }
 0x12a   :  { %v1447_v34 = vpack.c.bf16 %v364_v32, %v362_v31  ;;  %v402_v31 = vld [vmem:[%s3041_s3 + $0x5c8] sm:$0xff]  ;;  %v404_v32 = vld [vmem:[%s3041_s3 + $0x5d8] sm:$0xff] }
 0x12c   :  { %1422 = vmatpush1.bf16.msra.mxu1 %v1421_v40  ;;  %v1449_v40 = vpack.c.bf16 %v363_v36, %v361_v35  ;;  %v401_v35 = vld [vmem:[%s3041_s3 + $0x5c0] sm:$0xff]  ;;  %v403_v36 = vld [vmem:[%s3041_s3 + $0x5d0] sm:$0xff] }
 0x12d   :  { %1424 = vmatprep.subr.bf16.mxu1 %v1423_v43  ;;  %v367_v43 = vld [vmem:[%s3041_s3 + $0x4b0] sm:$0xff] }
 0x12e   :  { %v1453_v46 = vpack.c.bf16 %v367_v43, %v365_v42  ;;  %v405_v42 = vld [vmem:[%s3041_s3 + $0x5e0] sm:$0xff]  ;;  %v407_v43 = vld [vmem:[%s3041_s3 + $0x5f0] sm:$0xff] }
 0x130   :  { %1426 = vmatpush1.bf16.msra.mxu1 %v1425_v50  ;;  %v374_v50 = vld [vmem:[%s3041_s3 + $0x4e8] sm:$0xff] }
 0x131   :  { %1428 = vmatprep.subr.bf16.mxu1 %v1427_v52  ;;  %v1457_v52 = vpack.c.bf16 %v371_v49, %v369_v48  ;;  %v1459_v53 = vpack.c.bf16 %v376_v51, %v374_v50  ;;  %v202_v48 = vrot.slane %v2034_v21, 2  ;;  %v201_v49 = vrot.slane %v169_v45, 2  ;;  %v171_v50 = vld [vmem:[#allocation2 + $0x20] sm:$0xf]  ;;  %v822_v21 = vld [vmem:[%s3044_s4 + $0x188] sm:$0xff] }
 0x132   :  { %v1543_v55 = vpack.c.bf16 %v824_v7, %v822_v21  ;;  %v837_v45 = vld [vmem:[%s3044_s4 + $0x200] sm:$0xff] }
 0x133   :  { %v841_v7 = vld [vmem:[%s3044_s4 + $0x220] sm:$0xff] }
 0x134   :  { %1430 = vmatpush1.bf16.msra.mxu1 %v1429_v59  ;;  %v1463_v59 = vpack.c.bf16 %v380_v57, %v378_v56  ;;  %v823_v56 = vld [vmem:[%s3044_s4 + $0x190] sm:$0xff]  ;;  %1544 = vmatprep.subr.bf16.mxu0 %v1543_v55 }
 0x135   :  { %1432 = vmatprep.subr.bf16.mxu1 %v1431_v60  ;;  %v377_v60 = vld [vmem:[%s3041_s3 + $0x500] sm:$0xff]  ;;  %v843_v55 = vld [vmem:[%s3044_s4 + $0x230] sm:$0xff] }
 0x136   :  { %v1465_v0 = vpack.c.bf16 %v379_v61, %v377_v60  ;;  %v825_v61 = vld [vmem:[%s3044_s4 + $0x1a0] sm:$0xff] }
 0x137   :  { %570 = vmatmul.mubr.f32.vlgmr.msra.gmra.mrb[0].mxu1 %v182_v11  ;;  %v390_v11 = vld [vmem:[%s3041_s3 + $0x568] sm:$0xff] }
 0x138   :  { %1434 = vmatpush1.bf16.msra.mxu1 %v1433_v5  ;;  %575 = vmatprep.mubr.f32.mxu1 %v189_v6  ;;  %v388_v5 = vld [vmem:[%s3041_s3 + $0x558] sm:$0xff]  ;;  %v1469_v6 = vpack.c.bf16 %v383_v3, %v381_v2  ;;  %v829_v3 = vld [vmem:[%s3044_s4 + $0x1c0] sm:$0xff] }
 0x139   :  { %1436 = vmatprep.subr.bf16.mxu1 %v1435_v8  ;;  %v1471_v8 = vpack.c.bf16 %v388_v5, %v386_v4  ;;  %v831_v4 = vld [vmem:[%s3044_s4 + $0x1d0] sm:$0xff] }
 0x13a   :  { %v1553_v5 = vpack.c.bf16 %v831_v4, %v829_v3 }
 0x13b   :  { %576 = vmatmul.mubr.f32.gmra.mrb[2].mxu1 %v187_v23  ;;  %v393_v23 = vld [vmem:[%s3041_s3 + $0x580] sm:$0xff] }
 0x13c   :  { %1438 = vmatpush1.bf16.msra.mxu1 %v1437_v16  ;;  %581 = vmatprep.mubr.f32.mxu1 %v188_v63  ;;  %v384_v63 = vld [vmem:[%s3041_s3 + $0x538] sm:$0xff]  ;;  %v391_v16 = vld [vmem:[%s3041_s3 + $0x570] sm:$0xff] }
 0x13d   :  { %1440 = vmatprep.subr.bf16.mxu1 %v1439_v18  ;;  %v1467_v1 = vpack.c.bf16 %v384_v63, %v382_v62  ;;  %v394_v18 = vld [vmem:[%s3041_s3 + $0x588] sm:$0xff]  ;;  %v1477_v20 = vpack.c.bf16 %v391_v16, %v389_v14  ;;  %v827_v62 = vld [vmem:[%s3044_s4 + $0x1b0] sm:$0xff]  ;;  %v2603_v16 = vshrl.u32 %v124_v37, 7 }
 0x13e   :  { %v1479_v22 = vpack.c.bf16 %v396_v19, %v394_v18  ;;  %v1549_v63 = vpack.c.bf16 %v827_v62, %v825_v61  ;;  %v1256_v19 = vld [vmem:[%s3043_s5 + $0x1] ss:$4 sm:$0x3] }
 0x13f   :  { %582 = vmatmul.mubr.f32.gmra.mrb[4].mxu1 %v186_v12  ;;  %v392_v12 = vld [vmem:[%s3041_s3 + $0x578] sm:$0xff]  ;;  %v414_v18 = vsub.s32 0, %v2603_v16  ;;  %v845_v62 = vld [vmem:[%s3044_s4 + $0x240] sm:$0xff] }
 0x140   :  { %1442 = vmatpush1.bf16.msra.mxu1 %v1441_v26  ;;  %652 = vmatprep.mubr.f32.mxu1 %v206_v30  ;;  %v1475_v15 = vpack.c.bf16 %v392_v12, %v390_v11  ;;  %v400_v26 = vld [vmem:[%s3041_s3 + $0x5b8] sm:$0xff]  ;;  %v399_v30 = vld [vmem:[%s3041_s3 + $0x5b0] sm:$0xff] }
 0x141   :  { %1444 = vmatprep.subr.bf16.mxu1 %v1443_v27  ;;  %v1481_v27 = vpack.c.bf16 %v395_v24, %v393_v23  ;;  %v1483_v28 = vpack.c.bf16 %v400_v26, %v398_v25  ;;  %v835_v11 = vld [vmem:[%s3044_s4 + $0x1f0] sm:$0xff] }
 0x142   :  { %v1557_v12 = vpack.c.bf16 %v835_v11, %v833_v10  ;;  %v854_v11 = vld [vmem:[%s3044_s4 + $0x288] sm:$0xff] }
 0x144   :  { %1446 = vmatpush1.bf16.msra.mxu1 %v1445_v33  ;;  %v1485_v33 = vpack.c.bf16 %v399_v30, %v397_v29 }
 0x145   :  { %1448 = vmatprep.subr.bf16.mxu1 %v1447_v34  ;;  %v1487_v34 = vpack.c.bf16 %v404_v32, %v402_v31 }
 0x148   :  { %1450 = vmatpush1.bf16.msra.mxu1 %v1449_v40  ;;  %v1489_v40 = vpack.c.bf16 %v403_v36, %v401_v35 }
 0x149   :  { %1452 = vmatprep.subr.bf16.mxu1 %v1451_v41  ;;  %v1491_v41 = vpack.c.bf16 %v408_v39, %v406_v38 }
 0x14c   :  { %1454 = vmatpush1.bf16.msra.mxu1 %v1453_v46  ;;  %v1493_v46 = vpack.c.bf16 %v407_v43, %v405_v42 }
 0x14d   :  { %1456 = vmatprep.subr.bf16.mxu1 %v1455_v47  ;;  %v209_v47 = vrot.slane %v172_v44, 2 }
 0x14f   :  { %v210_v51 = vsel %vm200_vm3, %v205_v17, %v209_v47  ;;  %v821_v17 = vld [vmem:[%s3044_s4 + $0x180] sm:$0xff] }
 0x150   :  { %1458 = vmatpush1.bf16.msra.mxu1 %v1457_v52  ;;  %v203_v52 = vsel %vm200_vm3, %v201_v49, %v202_v48  ;;  %v1545_v57 = vpack.c.bf16 %v823_v56, %v821_v17  ;;  %v844_v49 = vld [vmem:[%s3044_s4 + $0x238] sm:$0xff] }
 0x151   :  { %1460 = vmatprep.subr.bf16.mxu1 %v1459_v53  ;;  %v207_v53 = vrot.slane %v171_v50, 2 }
 0x152   :  { %1546 = vmatpush1.bf16.msra.mxu0 %v1545_v57  ;;  %v846_v57 = vld [vmem:[%s3044_s4 + $0x248] sm:$0xff] }
 0x153   :  { %v208_v54 = vsel %vm200_vm3, %v202_v48, %v207_v53  ;;  %v842_v48 = vld [vmem:[%s3044_s4 + $0x228] sm:$0xff] }
 0x154   :  { %1462 = vmatpush1.bf16.msra.mxu1 %v1461_v58  ;;  %v826_v58 = vld [vmem:[%s3044_s4 + $0x1a8] sm:$0xff]  ;;  %v1563_v21 = vpack.c.bf16 %v844_v49, %v842_v48  ;;  %v871_v48 = vld [vmem:[%s3044_s4 + $0x310] sm:$0xff] }
 0x155   :  { %1464 = vmatprep.subr.bf16.mxu1 %v1463_v59  ;;  %v828_v59 = vld [vmem:[%s3044_s4 + $0x1b8] sm:$0xff]  ;;  %v874_v49 = vld [vmem:[%s3044_s4 + $0x328] sm:$0xff] }
 0x156   :  { %v1547_v60 = vpack.c.bf16 %v828_v59, %v826_v58  ;;  %v848_v58 = vld [vmem:[%s3044_s4 + $0x258] sm:$0xff]  ;;  %v1565_v59 = vpack.c.bf16 %v843_v55, %v841_v7 }
 0x157   :  { %v1567_v61 = vpack.c.bf16 %v848_v58, %v846_v57  ;;  %v880_v7 = vld [vmem:[%s3044_s4 + $0x358] sm:$0xff]  ;;  %v879_v57 = vld [vmem:[%s3044_s4 + $0x350] sm:$0xff]  ;;  %v882_v58 = vld [vmem:[%s3044_s4 + $0x368] sm:$0xff] }
 0x158   :  { %1466 = vmatpush1.bf16.msra.mxu1 %v1465_v0  ;;  %1548 = vmatprep.subr.bf16.mxu0 %v1547_v60  ;;  %v830_v0 = vld [vmem:[%s3044_s4 + $0x1c8] sm:$0xff] }
 0x159   :  { %1468 = vmatprep.subr.bf16.mxu1 %v1467_v1  ;;  %1550 = vmatpush1.bf16.msra.mxu0 %v1549_v63  ;;  %v832_v1 = vld [vmem:[%s3044_s4 + $0x1d8] sm:$0xff]  ;;  %v847_v63 = vld [vmem:[%s3044_s4 + $0x250] sm:$0xff] }
 0x15a   :  { %v1551_v2 = vpack.c.bf16 %v832_v1, %v830_v0  ;;  %v850_v1 = vld [vmem:[%s3044_s4 + $0x268] sm:$0xff]  ;;  %v1569_v3 = vpack.c.bf16 %v847_v63, %v845_v62  ;;  %v881_v63 = vld [vmem:[%s3044_s4 + $0x360] sm:$0xff] }
 0x15c   :  { %1470 = vmatpush1.bf16.msra.mxu1 %v1469_v6  ;;  %1552 = vmatprep.subr.bf16.mxu0 %v1551_v2  ;;  %v834_v6 = vld [vmem:[%s3044_s4 + $0x1e8] sm:$0xff]  ;;  %v852_v2 = vld [vmem:[%s3044_s4 + $0x278] sm:$0xff] }
 0x15d   :  { %1472 = vmatprep.subr.bf16.mxu1 %v1471_v8  ;;  %1554 = vmatpush1.bf16.msra.mxu0 %v1553_v5  ;;  %v836_v8 = vld [vmem:[%s3044_s4 + $0x1f8] sm:$0xff] }
 0x15e   :  { %v1555_v9 = vpack.c.bf16 %v836_v8, %v834_v6  ;;  %v1571_v6 = vpack.c.bf16 %v852_v2, %v850_v1  ;;  %v849_v8 = vld [vmem:[%s3044_s4 + $0x260] sm:$0xff]  ;;  %v883_v1 = vld [vmem:[%s3044_s4 + $0x370] sm:$0xff]  ;;  %v886_v2 = vld [vmem:[%s3044_s4 + $0x388] sm:$0xff] }
 0x160   :  { %1474 = vmatpush1.bf16.msra.mxu1 %v1473_v13  ;;  %1556 = vmatprep.subr.bf16.mxu0 %v1555_v9  ;;  %v838_v13 = vld [vmem:[%s3044_s4 + $0x208] sm:$0xff]  ;;  %v851_v9 = vld [vmem:[%s3044_s4 + $0x270] sm:$0xff] }
 0x161   :  { %1476 = vmatprep.subr.bf16.mxu1 %v1475_v15  ;;  %1558 = vmatpush1.bf16.msra.mxu0 %v1557_v12  ;;  %v840_v15 = vld [vmem:[%s3044_s4 + $0x218] sm:$0xff] }
 0x162   :  { %v1559_v14 = vpack.c.bf16 %v840_v15, %v838_v13  ;;  %v856_v12 = vld [vmem:[%s3044_s4 + $0x298] sm:$0xff] }
 0x164   :  { %1478 = vmatpush1.bf16.msra.mxu1 %v1477_v20  ;;  %1560 = vmatprep.subr.bf16.mxu0 %v1559_v14  ;;  %v418_v20 = vsub.s32 1, %v2603_v16  ;;  %v1573_v14 = vpack.c.bf16 %v851_v9, %v849_v8  ;;  %v885_v8 = vld [vmem:[%s3044_s4 + $0x380] sm:$0xff]  ;;  %v887_v9 = vld [vmem:[%s3044_s4 + $0x390] sm:$0xff] }
 0x165   :  { %1480 = vmatprep.subr.bf16.mxu1 %v1479_v22  ;;  %v415_v22 = vrot.slane %v1256_v19, %v414_v18 }
 0x166   :  { %v419_v23 = vrot.slane %v1256_v19, %v418_v20 }
 0x168   :  { %1482 = vmatpush1.bf16.msra.mxu1 %v1481_v27 }
 0x169   :  { %1484 = vmatprep.subr.bf16.mxu1 %v1483_v28 }
 0x16c   :  { %1486 = vmatpush1.bf16.msra.mxu1 %v1485_v33 }
 0x16d   :  { %1488 = vmatprep.subr.bf16.mxu1 %v1487_v34 }
 0x170   :  { %1490 = vmatpush1.bf16.msra.mxu1 %v1489_v40 }
 0x171   :  { %1492 = vmatprep.subr.bf16.mxu1 %v1491_v41 }
 0x174   :  { %1494 = vmatpush1.bf16.msra.mxu1 %v1493_v46  ;;  %v839_v46 = vld [vmem:[%s3044_s4 + $0x210] sm:$0xff] }
 0x177   :  { %653 = vmatmul.mubr.f32.vlgmr.msra.gmra.mrb[0].mxu1 %v203_v52  ;;  %v1561_v52 = vpack.c.bf16 %v839_v46, %v837_v45 }
 0x178   :  { %658 = vmatprep.mubr.f32.mxu1 %v210_v51 }
 0x17b   :  { %659 = vmatmul.mubr.f32.gmra.mrb[2].mxu1 %v208_v54 }
 0x17c   :  { %664 = vmatprep.mubr.f32.mxu1 %v209_v47 }
 0x17f   :  { %665 = vmatmul.mubr.f32.gmra.mrb[4].mxu1 %v207_v53 }
 0x24a   :  { %v654_v24 = vpop.f32.mrb[0].mxu1 }
 0x24b   :  { %v1687_v25 = vadd.f32 %v654_v24, %v415_v22  ;;  %v656_v26 = vpop.f32.mrb[1].mxu1  ;;  %v855_v24 = vld [vmem:[%s3044_s4 + $0x290] sm:$0xff] }
 0x24c   :  { %v1688_v27 = vadd.f32 %v656_v26, %v419_v23  ;;  %v860_v26 = vld [vmem:[%s3044_s4 + $0x2b8] sm:$0xff] }
 0x24d   :  { %v671_v37 = vmax.f32 %v1687_v25, 0.0  ;;  %v858_v25 = vld [vmem:[%s3044_s4 + $0x2a8] sm:$0xff] }
 0x24e   :  { %v672_v28 = vmax.f32 %v1688_v27, 0.0  ;;  %v660_v29 = vpop.f32.mrb[2].mxu1 }
 0x24f   :  { %v684_v30 = vrot.slane %v671_v37, 7  ;;  %v1689_v31 = vadd.f32 %v660_v29, %v415_v22  ;;  %v662_v32 = vpop.f32.mrb[3].mxu1  ;;  %v1579_v37 = vpack.c.bf16 %v860_v26, %v858_v25  ;;  %v859_v29 = vld [vmem:[%s3044_s4 + $0x2b0] sm:$0xff]  ;;  %v893_v25 = vld [vmem:[%s3044_s4 + $0x3c0] sm:$0xff] }
 0x250   :  { %v685_v33 = vrot.slane %v672_v28, 7  ;;  %v1690_v34 = vadd.f32 %v662_v32, %v419_v23  ;;  %v857_v28 = vld [vmem:[%s3044_s4 + $0x2a0] sm:$0xff]  ;;  %v895_v26 = vld [vmem:[%s3044_s4 + $0x3d0] sm:$0xff] }
 0x251   :  { %688 = vst [vmem:[#allocation3] sm:$0xfe] %v684_v30  ;;  %690 = vst [vmem:[#allocation3 + $0x10] sm:$0x1] %v684_v30  ;;  %v673_v35 = vmax.f32 %v1689_v31, 0.0  ;;  %v862_v30 = vld [vmem:[%s3044_s4 + $0x2c8] sm:$0xff]  ;;  %v1581_v32 = vpack.c.bf16 %v859_v29, %v857_v28  ;;  %v1617_v28 = vpack.c.bf16 %v895_v26, %v893_v25 }
 0x252   :  { %689 = vst [vmem:[#allocation3 + $0x8] sm:$0xfe] %v685_v33  ;;  %691 = vst [vmem:[#allocation3 + $0x18] sm:$0x1] %v685_v33  ;;  %v674_v36 = vmax.f32 %v1690_v34, 0.0  ;;  %v666_v38 = vpop.f32.mrb[4].mxu1 }
 0x253   :  { %v703_v39 = vrot.slane %v673_v35, 7  ;;  %v1691_v40 = vadd.f32 %v666_v38, %v415_v22  ;;  %v668_v41 = vpop.f32.mrb[5].mxu1  ;;  %v1575_v22 = vpack.c.bf16 %v856_v12, %v854_v11  ;;  %v864_v31 = vld [vmem:[%s3044_s4 + $0x2d8] sm:$0xff]  ;;  %v861_v34 = vld [vmem:[%s3044_s4 + $0x2c0] sm:$0xff]  ;;  %v863_v35 = vld [vmem:[%s3044_s4 + $0x2d0] sm:$0xff]  ;;  %v1609_v12 = vpack.c.bf16 %v887_v9, %v885_v8 }
 0x254   :  { %v704_v42 = vrot.slane %v674_v36, 7  ;;  %v1692_v43 = vadd.f32 %v668_v41, %v419_v23  ;;  %v853_v23 = vld [vmem:[%s3044_s4 + $0x280] sm:$0xff]  ;;  %v1583_v33 = vpack.c.bf16 %v864_v31, %v862_v30  ;;  %v866_v36 = vld [vmem:[%s3044_s4 + $0x2e8] sm:$0xff]  ;;  %v868_v38 = vld [vmem:[%s3044_s4 + $0x2f8] sm:$0xff] }
 0x255   :  { %713 = vst [vmem:[#allocation3 + $0x10] sm:$0xf8] %v703_v39  ;;  %v675_v44 = vmax.f32 %v1691_v40, 0.0  ;;  %v1577_v27 = vpack.c.bf16 %v855_v24, %v853_v23  ;;  %v1587_v40 = vpack.c.bf16 %v868_v38, %v866_v36  ;;  %v865_v41 = vld [vmem:[%s3044_s4 + $0x2e0] sm:$0xff]  ;;  %v892_v11 = vld [vmem:[%s3044_s4 + $0x3b8] sm:$0xff]  ;;  %v899_v31 = vld [vmem:[%s3044_s4 + $0x3f0] sm:$0xff] }
 0x256   :  { %714 = vst [vmem:[#allocation3 + $0x18] sm:$0xf8] %v704_v42  ;;  %v676_v47 = vmax.f32 %v1692_v43, 0.0  ;;  %v870_v43 = vld [vmem:[%s3044_s4 + $0x308] sm:$0xff]  ;;  %v897_v30 = vld [vmem:[%s3044_s4 + $0x3e0] sm:$0xff]  ;;  %v928_v25 = vld [vmem:[%s3044_s4 + $0x4d8] sm:$0xff] }
 0x257   :  { %v705_v50 = vrot.slane %v675_v44, 7  ;;  %v872_v44 = vld [vmem:[%s3044_s4 + $0x318] sm:$0xff] }
 0x258   :  { %v707_v51 = vrot.slane %v676_v47, 7  ;;  %v717_v56 = vld [vmem:[#allocation3] sm:$0xff]  ;;  %v1591_v46 = vpack.c.bf16 %v872_v44, %v870_v43  ;;  %v869_v47 = vld [vmem:[%s3044_s4 + $0x300] sm:$0xff]  ;;  %v908_v43 = vld [vmem:[%s3044_s4 + $0x438] sm:$0xff] }
 0x259   :  { %v706_v53 = vsel %vm702_vm4, %v703_v39, %v705_v50  ;;  %v718_v54 = vld [vmem:[#allocation3 + $0x8] sm:$0xff]  ;;  %v1585_v39 = vpack.c.bf16 %v863_v35, %v861_v34  ;;  %v1621_v34 = vpack.c.bf16 %v899_v31, %v897_v30  ;;  %v723_v36 = vld [vmem:[#allocation3] sm:$0xfe] }
 0x25a   :  { %715 = vst [vmem:[#allocation3 + $0x20] sm:$0x7] %v706_v53  ;;  %v708_v17 = vsel %vm702_vm4, %v704_v42, %v707_v51  ;;  %1042 = vmatprep.mubr.f32.mxu0 %v718_v54  ;;  %v724_v4 = vld [vmem:[#allocation3 + $0x8] sm:$0xfe]  ;;  %v867_v42 = vld [vmem:[%s3044_s4 + $0x2f0] sm:$0xff]  ;;  %v1593_v51 = vpack.c.bf16 %v871_v48, %v869_v47  ;;  %v873_v53 = vld [vmem:[%s3044_s4 + $0x320] sm:$0xff] }
 0x25b   :  { %716 = vst [vmem:[#allocation3 + $0x28] sm:$0x7] %v708_v17  ;;  %1043 = vmatmul.mubr.f32.vlgmr.msra.gmra.mrb[2].mxu0 %v717_v56  ;;  %v740_v13 = vrot.slane %v724_v4, 1  ;;  %v1589_v45 = vpack.c.bf16 %v867_v42, %v865_v41  ;;  %v876_v50 = vld [vmem:[%s3044_s4 + $0x338] sm:$0xff]  ;;  %v875_v54 = vld [vmem:[%s3044_s4 + $0x330] sm:$0xff]  ;;  %v877_v56 = vld [vmem:[%s3044_s4 + $0x340] sm:$0xff]  ;;  %v1605_v4 = vpack.c.bf16 %v883_v1, %v881_v63 }
 0x25c   :  { %1562 = vmatpush1.bf16.msra.mxu0 %v1561_v52  ;;  %v2647_v0 = vld [vmem:[#allocation3 + $0x10] sm:$0xff]  ;;  %v1595_v52 = vpack.c.bf16 %v876_v50, %v874_v49  ;;  %v1597_v55 = vpack.c.bf16 %v875_v54, %v873_v53  ;;  %v906_v42 = vld [vmem:[%s3044_s4 + $0x428] sm:$0xff]  ;;  %v907_v50 = vld [vmem:[%s3044_s4 + $0x430] sm:$0xff] }
 0x25d   :  { %v2638_v60 = vld [vmem:[#allocation3 + $0x18] sm:$0xff]  ;;  %1564 = vmatprep.subr.bf16.mxu0 %v1563_v21  ;;  %v738_v41 = vrot.slane %v2647_v0, 1  ;;  %v1627_v48 = vpack.c.bf16 %v908_v43, %v906_v42  ;;  %v905_v49 = vld [vmem:[%s3044_s4 + $0x420] sm:$0xff]  ;;  %v912_v54 = vld [vmem:[%s3044_s4 + $0x458] sm:$0xff] }
 0x25e   :  { %1048 = vmatprep.mubr.f32.mxu0 %v2638_v60  ;;  %v741_v5 = vrot.slane %v2638_v60, 1  ;;  %v878_v21 = vld [vmem:[%s3044_s4 + $0x348] sm:$0xff]  ;;  %v932_v30 = vld [vmem:[%s3044_s4 + $0x4f8] sm:$0xff] }
 0x25f   :  { %1049 = vmatmul.mubr.f32.gmra.mrb[4].mxu0 %v2647_v0  ;;  %v1599_v17 = vpack.c.bf16 %v880_v7, %v878_v21  ;;  %v910_v53 = vld [vmem:[%s3044_s4 + $0x448] sm:$0xff]  ;;  %v1629_v7 = vpack.c.bf16 %v907_v50, %v905_v49  ;;  %v940_v43 = vld [vmem:[%s3044_s4 + $0x538] sm:$0xff] }
 0x260   :  { %1566 = vmatpush1.bf16.msra.mxu0 %v1565_v59  ;;  %v742_v19 = vsel %vm179_vm2, %v740_v13, %v741_v5  ;;  %v884_v59 = vld [vmem:[%s3044_s4 + $0x378] sm:$0xff]  ;;  %v938_v42 = vld [vmem:[%s3044_s4 + $0x528] sm:$0xff] }
 0x261   :  { %1568 = vmatprep.subr.bf16.mxu0 %v1567_v61  ;;  %v721_v15 = vld [vmem:[#allocation3 + $0x20] sm:$0x3]  ;;  %v1601_v61 = vpack.c.bf16 %v879_v57, %v877_v56  ;;  %v1603_v62 = vpack.c.bf16 %v884_v59, %v882_v58  ;;  %v728_v58 = vld [vmem:[#allocation3 + $0x8] sm:$0xfc] }
 0x262   :  { %v722_v10 = vld [vmem:[#allocation3 + $0x28] sm:$0x3]  ;;  %v911_v56 = vld [vmem:[%s3044_s4 + $0x450] sm:$0xff]  ;;  %v760_v63 = vrot.slane %v728_v58, 2 }
 0x263   :  { %1054 = vmatprep.mubr.f32.mxu0 %v722_v10  ;;  %v890_v10 = vld [vmem:[%s3044_s4 + $0x3a8] sm:$0xff]  ;;  %v726_v35 = vld [vmem:[#allocation3 + $0x28] sm:$0x7] }
 0x264   :  { %1570 = vmatpush1.bf16.msra.mxu0 %v1569_v3  ;;  %v888_v3 = vld [vmem:[%s3044_s4 + $0x398] sm:$0xff]  ;;  %v1611_v13 = vpack.c.bf16 %v892_v11, %v890_v10  ;;  %v745_v44 = vrot.slane %v726_v35, 1  ;;  %v917_v11 = vld [vmem:[%s3044_s4 + $0x480] sm:$0xff]  ;;  %v934_v35 = vld [vmem:[%s3044_s4 + $0x508] sm:$0xff] }
 0x265   :  { %1055 = vmatmul.mubr.f32.gmra.mrb[6].mxu0 %v721_v15  ;;  %1572 = vmatprep.subr.bf16.mxu0 %v1571_v6  ;;  %v1607_v6 = vpack.c.bf16 %v888_v3, %v886_v2  ;;  %v889_v15 = vld [vmem:[%s3044_s4 + $0x3a0] sm:$0xff]  ;;  %v916_v59 = vld [vmem:[%s3044_s4 + $0x478] sm:$0xff]  ;;  %v915_v3 = vld [vmem:[%s3044_s4 + $0x470] sm:$0xff] }
 0x266   :  { %1125 = vmatprep.mubr.f32.mxu0 %v742_v19  ;;  %v894_v19 = vld [vmem:[%s3044_s4 + $0x3c8] sm:$0xff]  ;;  %v746_v21 = vsel %vm179_vm2, %v741_v5, %v745_v44  ;;  %v913_v2 = vld [vmem:[%s3044_s4 + $0x460] sm:$0xff]  ;;  %v944_v49 = vld [vmem:[%s3044_s4 + $0x558] sm:$0xff] }
 0x267   :  { %v914_v5 = vld [vmem:[%s3044_s4 + $0x468] sm:$0xff]  ;;  %v1637_v9 = vpack.c.bf16 %v915_v3, %v913_v2  ;;  %v952_v58 = vld [vmem:[%s3044_s4 + $0x598] sm:$0xff] }
 0x268   :  { %1574 = vmatpush1.bf16.msra.mxu0 %v1573_v14  ;;  %v891_v14 = vld [vmem:[%s3044_s4 + $0x3b0] sm:$0xff]  ;;  %v1635_v1 = vpack.c.bf16 %v916_v59, %v914_v5  ;;  %v956_v2 = vld [vmem:[%s3044_s4 + $0x5b8] sm:$0xff] }
 0x269   :  { %1576 = vmatprep.subr.bf16.mxu0 %v1575_v22  ;;  %v896_v22 = vld [vmem:[%s3044_s4 + $0x3d8] sm:$0xff]  ;;  %v1613_v23 = vpack.c.bf16 %v891_v14, %v889_v15 }
 0x26a   :  { %v1615_v24 = vpack.c.bf16 %v896_v22, %v894_v19  ;;  %v924_v15 = vld [vmem:[%s3044_s4 + $0x4b8] sm:$0xff]  ;;  %v921_v22 = vld [vmem:[%s3044_s4 + $0x4a0] sm:$0xff] }
 0x26c   :  { %1578 = vmatpush1.bf16.msra.mxu0 %v1577_v27  ;;  %v898_v27 = vld [vmem:[%s3044_s4 + $0x3e8] sm:$0xff] }
 0x26d   :  { %1580 = vmatprep.subr.bf16.mxu0 %v1579_v37  ;;  %v900_v37 = vld [vmem:[%s3044_s4 + $0x3f8] sm:$0xff] }
 0x26e   :  { %v1619_v29 = vpack.c.bf16 %v900_v37, %v898_v27  ;;  %v925_v37 = vld [vmem:[%s3044_s4 + $0x4c0] sm:$0xff] }
 0x270   :  { %1582 = vmatpush1.bf16.msra.mxu0 %v1581_v32  ;;  %v902_v32 = vld [vmem:[%s3044_s4 + $0x408] sm:$0xff] }
 0x271   :  { %1584 = vmatprep.subr.bf16.mxu0 %v1583_v33  ;;  %v904_v33 = vld [vmem:[%s3044_s4 + $0x418] sm:$0xff] }
 0x272   :  { %v1623_v38 = vpack.c.bf16 %v904_v33, %v902_v32  ;;  %v929_v33 = vld [vmem:[%s3044_s4 + $0x4e0] sm:$0xff] }
 0x274   :  { %1586 = vmatpush1.bf16.msra.mxu0 %v1585_v39  ;;  %v901_v39 = vld [vmem:[%s3044_s4 + $0x400] sm:$0xff] }
 0x275   :  { %1588 = vmatprep.subr.bf16.mxu0 %v1587_v40  ;;  %v903_v40 = vld [vmem:[%s3044_s4 + $0x410] sm:$0xff] }
 0x276   :  { %v1625_v47 = vpack.c.bf16 %v903_v40, %v901_v39  ;;  %v933_v40 = vld [vmem:[%s3044_s4 + $0x500] sm:$0xff] }
 0x278   :  { %1590 = vmatpush1.bf16.msra.mxu0 %v1589_v45  ;;  %v725_v45 = vld [vmem:[#allocation3 + $0x20] sm:$0x7] }
 0x279   :  { %1592 = vmatprep.subr.bf16.mxu0 %v1591_v46  ;;  %v737_v46 = vrot.slane %v723_v36, 1  ;;  %v936_v36 = vld [vmem:[%s3044_s4 + $0x518] sm:$0xff] }
 0x27a   :  { %v1655_v39 = vpack.c.bf16 %v936_v36, %v934_v35 }
 0x27c   :  { %1594 = vmatpush1.bf16.msra.mxu0 %v1593_v51  ;;  %v739_v51 = vsel %vm179_vm2, %v737_v46, %v738_v41  ;;  %v937_v46 = vld [vmem:[%s3044_s4 + $0x520] sm:$0xff] }
 0x27d   :  { %1596 = vmatprep.subr.bf16.mxu0 %v1595_v52  ;;  %v743_v52 = vrot.slane %v725_v45, 1  ;;  %v1659_v45 = vpack.c.bf16 %v940_v43, %v938_v42 }
 0x27f   :  { %v744_v57 = vsel %vm179_vm2, %v738_v41, %v743_v52  ;;  %v935_v41 = vld [vmem:[%s3044_s4 + $0x510] sm:$0xff] }
 0x280   :  { %1598 = vmatpush1.bf16.msra.mxu0 %v1597_v55  ;;  %v1631_v55 = vpack.c.bf16 %v912_v54, %v910_v53  ;;  %v943_v53 = vld [vmem:[%s3044_s4 + $0x550] sm:$0xff]  ;;  %v946_v54 = vld [vmem:[%s3044_s4 + $0x568] sm:$0xff] }
 0x281   :  { %1600 = vmatprep.subr.bf16.mxu0 %v1599_v17  ;;  %v909_v17 = vld [vmem:[%s3044_s4 + $0x440] sm:$0xff] }
 0x284   :  { %1602 = vmatpush1.bf16.msra.mxu0 %v1601_v61  ;;  %v761_v61 = vrot.slane %v2638_v60, 2 }
 0x285   :  { %1604 = vmatprep.subr.bf16.mxu0 %v1603_v62  ;;  %v1633_v62 = vpack.c.bf16 %v911_v56, %v909_v17  ;;  %v945_v17 = vld [vmem:[%s3044_s4 + $0x560] sm:$0xff]  ;;  %v947_v56 = vld [vmem:[%s3044_s4 + $0x570] sm:$0xff] }
 0x286   :  { %v762_v8 = vsel %vm200_vm3, %v760_v63, %v761_v61  ;;  %v1669_v5 = vpack.c.bf16 %v947_v56, %v945_v17  ;;  %v951_v63 = vld [vmem:[%s3044_s4 + $0x590] sm:$0xff] }
 0x288   :  { %1606 = vmatpush1.bf16.msra.mxu0 %v1605_v4  ;;  %v918_v4 = vld [vmem:[%s3044_s4 + $0x488] sm:$0xff] }
 0x289   :  { %1608 = vmatprep.subr.bf16.mxu0 %v1607_v6  ;;  %v920_v6 = vld [vmem:[%s3044_s4 + $0x498] sm:$0xff] }
 0x28a   :  { %v1639_v10 = vpack.c.bf16 %v920_v6, %v918_v4  ;;  %v953_v6 = vld [vmem:[%s3044_s4 + $0x5a0] sm:$0xff] }
 0x28c   :  { %1610 = vmatpush1.bf16.msra.mxu0 %v1609_v12  ;;  %v919_v12 = vld [vmem:[%s3044_s4 + $0x490] sm:$0xff] }
 0x28d   :  { %1612 = vmatprep.subr.bf16.mxu0 %v1611_v13  ;;  %v922_v13 = vld [vmem:[%s3044_s4 + $0x4a8] sm:$0xff]  ;;  %v1641_v14 = vpack.c.bf16 %v919_v12, %v917_v11 }
 0x28e   :  { %v1643_v19 = vpack.c.bf16 %v924_v15, %v922_v13  ;;  %v957_v13 = vld [vmem:[%s3044_s4 + $0x5c0] sm:$0xff]  ;;  %v959_v15 = vld [vmem:[%s3044_s4 + $0x5d0] sm:$0xff] }
 0x290   :  { %1614 = vmatpush1.bf16.msra.mxu0 %v1613_v23  ;;  %v923_v23 = vld [vmem:[%s3044_s4 + $0x4b0] sm:$0xff] }
 0x291   :  { %1616 = vmatprep.subr.bf16.mxu0 %v1615_v24  ;;  %v926_v24 = vld [vmem:[%s3044_s4 + $0x4c8] sm:$0xff]  ;;  %v1645_v26 = vpack.c.bf16 %v923_v23, %v921_v22  ;;  %v1681_v22 = vpack.c.bf16 %v959_v15, %v957_v13 }
 0x292   :  { %v1647_v27 = vpack.c.bf16 %v928_v25, %v926_v24  ;;  %v961_v24 = vld [vmem:[%s3044_s4 + $0x5e0] sm:$0xff]  ;;  %v963_v25 = vld [vmem:[%s3044_s4 + $0x5f0] sm:$0xff] }
 0x294   :  { %1618 = vmatpush1.bf16.msra.mxu0 %v1617_v28  ;;  %v927_v28 = vld [vmem:[%s3044_s4 + $0x4d0] sm:$0xff] }
 0x295   :  { %1620 = vmatprep.subr.bf16.mxu0 %v1619_v29  ;;  %v930_v29 = vld [vmem:[%s3044_s4 + $0x4e8] sm:$0xff]  ;;  %v1649_v31 = vpack.c.bf16 %v927_v28, %v925_v37  ;;  %v727_v37 = vld [vmem:[#allocation3] sm:$0xfc]  ;;  %v758_v28 = vrot.slane %v2647_v0, 2 }
 0x296   :  { %v1651_v32 = vpack.c.bf16 %v932_v30, %v930_v29  ;;  %v729_v30 = vld [vmem:[#allocation3 + $0x20] sm:$0xf]  ;;  %v1257_v0 = vld [vmem:[%s3043_s5 + $0x2] ss:$4 sm:$0x3] }
 0x297   :  { %v971_v36 = vrot.slane %v1257_v0, %v414_v18 }
 0x298   :  { %1622 = vmatpush1.bf16.msra.mxu0 %v1621_v34  ;;  %v931_v34 = vld [vmem:[%s3044_s4 + $0x4f0] sm:$0xff] }
 0x299   :  { %1624 = vmatprep.subr.bf16.mxu0 %v1623_v38  ;;  %v1653_v38 = vpack.c.bf16 %v931_v34, %v929_v33  ;;  %v763_v33 = vrot.slane %v729_v30, 2 }
 0x29b   :  { %1126 = vmatmul.mubr.f32.vlgmr.msra.gmra.mrb[2].mxu0 %v739_v51  ;;  %v764_v35 = vsel %vm200_vm3, %v758_v28, %v763_v33 }
 0x29c   :  { %1131 = vmatprep.mubr.f32.mxu0 %v746_v21  ;;  %1626 = vmatpush1.bf16.msra.mxu0 %v1625_v47  ;;  %v939_v47 = vld [vmem:[%s3044_s4 + $0x530] sm:$0xff]  ;;  %v948_v21 = vld [vmem:[%s3044_s4 + $0x578] sm:$0xff] }
 0x29d   :  { %1628 = vmatprep.subr.bf16.mxu0 %v1627_v48  ;;  %v942_v48 = vld [vmem:[%s3044_s4 + $0x548] sm:$0xff]  ;;  %v1661_v50 = vpack.c.bf16 %v939_v47, %v937_v46 }
 0x29e   :  { %v1663_v51 = vpack.c.bf16 %v944_v49, %v942_v48 }
 0x29f   :  { %1132 = vmatmul.mubr.f32.gmra.mrb[4].mxu0 %v744_v57  ;;  %v950_v57 = vld [vmem:[%s3044_s4 + $0x588] sm:$0xff] }
 0x2a0   :  { %1137 = vmatprep.mubr.f32.mxu0 %v745_v44  ;;  %1630 = vmatpush1.bf16.msra.mxu0 %v1629_v7  ;;  %v1657_v44 = vpack.c.bf16 %v935_v41, %v933_v40  ;;  %v1671_v59 = vpack.c.bf16 %v952_v58, %v950_v57 }
 0x2a1   :  { %1632 = vmatprep.subr.bf16.mxu0 %v1631_v55  ;;  %v1667_v55 = vpack.c.bf16 %v948_v21, %v946_v54 }
 0x2a3   :  { %1138 = vmatmul.mubr.f32.gmra.mrb[6].mxu0 %v743_v52  ;;  %v941_v52 = vld [vmem:[%s3044_s4 + $0x540] sm:$0xff] }
 0x2a4   :  { %1634 = vmatpush1.bf16.msra.mxu0 %v1633_v62  ;;  %1208 = vmatprep.mubr.f32.mxu0 %v762_v8  ;;  %v1665_v7 = vpack.c.bf16 %v943_v53, %v941_v52  ;;  %v949_v62 = vld [vmem:[%s3044_s4 + $0x580] sm:$0xff]  ;;  %v955_v8 = vld [vmem:[%s3044_s4 + $0x5b0] sm:$0xff] }
 0x2a5   :  { %1636 = vmatprep.subr.bf16.mxu0 %v1635_v1  ;;  %v954_v1 = vld [vmem:[%s3044_s4 + $0x5a8] sm:$0xff]  ;;  %v1673_v3 = vpack.c.bf16 %v951_v63, %v949_v62  ;;  %v1677_v11 = vpack.c.bf16 %v955_v8, %v953_v6 }
 0x2a6   :  { %v1675_v4 = vpack.c.bf16 %v956_v2, %v954_v1 }
 0x2a8   :  { %1638 = vmatpush1.bf16.msra.mxu0 %v1637_v9  ;;  %v958_v9 = vld [vmem:[%s3044_s4 + $0x5c8] sm:$0xff] }
 0x2a9   :  { %1640 = vmatprep.subr.bf16.mxu0 %v1639_v10  ;;  %v960_v10 = vld [vmem:[%s3044_s4 + $0x5d8] sm:$0xff] }
 0x2aa   :  { %v1679_v12 = vpack.c.bf16 %v960_v10, %v958_v9 }
 0x2ac   :  { %1642 = vmatpush1.bf16.msra.mxu0 %v1641_v14  ;;  %v962_v14 = vld [vmem:[%s3044_s4 + $0x5e8] sm:$0xff] }
 0x2ad   :  { %1644 = vmatprep.subr.bf16.mxu0 %v1643_v19  ;;  %v964_v19 = vld [vmem:[%s3044_s4 + $0x5f8] sm:$0xff] }
 0x2ae   :  { %v1683_v23 = vpack.c.bf16 %v964_v19, %v962_v14 }
 0x2b0   :  { %1646 = vmatpush1.bf16.msra.mxu0 %v1645_v26  ;;  %v1685_v26 = vpack.c.bf16 %v963_v25, %v961_v24 }
 0x2b1   :  { %1648 = vmatprep.subr.bf16.mxu0 %v1647_v27  ;;  %v730_v27 = vld [vmem:[#allocation3 + $0x28] sm:$0xf] }
 0x2b2   :  { %v765_v29 = vrot.slane %v730_v27, 2 }
 0x2b4   :  { %1650 = vmatpush1.bf16.msra.mxu0 %v1649_v31  ;;  %v757_v31 = vrot.slane %v727_v37, 2  ;;  %v766_v34 = vsel %vm200_vm3, %v761_v61, %v765_v29 }
 0x2b5   :  { %1652 = vmatprep.subr.bf16.mxu0 %v1651_v32 }
 0x2b6   :  { %v759_v32 = vsel %vm200_vm3, %v757_v31, %v758_v28 }
 0x2b8   :  { %1654 = vmatpush1.bf16.msra.mxu0 %v1653_v38  ;;  %v975_v38 = vrot.slane %v1257_v0, %v418_v20 }
 0x2b9   :  { %1656 = vmatprep.subr.bf16.mxu0 %v1655_v39 }
 0x2bc   :  { %1658 = vmatpush1.bf16.msra.mxu0 %v1657_v44 }
 0x2bd   :  { %1660 = vmatprep.subr.bf16.mxu0 %v1659_v45 }
 0x2c0   :  { %1662 = vmatpush1.bf16.msra.mxu0 %v1661_v50 }
 0x2c1   :  { %1664 = vmatprep.subr.bf16.mxu0 %v1663_v51 }
 0x2c4   :  { %1666 = vmatpush1.bf16.msra.mxu0 %v1665_v7 }
 0x2c5   :  { %1668 = vmatprep.subr.bf16.mxu0 %v1667_v55 }
 0x2c8   :  { %1670 = vmatpush1.bf16.msra.mxu0 %v1669_v5 }
 0x2c9   :  { %1672 = vmatprep.subr.bf16.mxu0 %v1671_v59 }
 0x2cc   :  { %1674 = vmatpush1.bf16.msra.mxu0 %v1673_v3 }
 0x2cd   :  { %1676 = vmatprep.subr.bf16.mxu0 %v1675_v4 }
 0x2d0   :  { %1678 = vmatpush1.bf16.msra.mxu0 %v1677_v11 }
 0x2d1   :  { %1680 = vmatprep.subr.bf16.mxu0 %v1679_v12 }
 0x2d4   :  { %1682 = vmatpush1.bf16.msra.mxu0 %v1681_v22 }
 0x2d5   :  { %1684 = vmatprep.subr.bf16.mxu0 %v1683_v23 }
 0x2d8   :  { %1686 = vmatpush1.bf16.msra.mxu0 %v1685_v26 }
 0x2db   :  { %1209 = vmatmul.mubr.f32.vlgmr.msra.gmra.mrb[2].mxu0 %v759_v32 }
 0x2dc   :  { %1214 = vmatprep.mubr.f32.mxu0 %v766_v34 }
 0x2df   :  { %1215 = vmatmul.mubr.f32.gmra.mrb[4].mxu0 %v764_v35 }
 0x2e0   :  { %1220 = vmatprep.mubr.f32.mxu0 %v765_v29 }
 0x2e3   :  { %1221 = vmatmul.mubr.f32.gmra.mrb[6].mxu0 %v763_v33 }
 0x3ae   :  { %v1210_v39 = vpop.f32.mrb[2].mxu0 }
 0x3af   :  { %v1693_v60 = vadd.f32 %v1210_v39, %v971_v36  ;;  %v1212_v40 = vpop.f32.mrb[3].mxu0 }
 0x3b0   :  { %v1694_v61 = vadd.f32 %v1212_v40, %v975_v38 }
 0x3b1   :  { %v1227_v41 = vmax.f32 %v1693_v60, 0.0 }
 0x3b2   :  { %v1228_v42 = vmax.f32 %v1694_v61, 0.0  ;;  %v1216_v43 = vpop.f32.mrb[4].mxu0 }
 0x3b3   :  { %1233 = vst [vmem:[%s3045_s6] sm:$0xff] %v1227_v41  ;;  %v1695_v44 = vadd.f32 %v1216_v43, %v971_v36  ;;  %v1218_v45 = vpop.f32.mrb[5].mxu0 }
 0x3b4   :  { %1234 = vst [vmem:[%s3045_s6 + $0x8] sm:$0xff] %v1228_v42  ;;  %v1696_v18 = vadd.f32 %v1218_v45, %v975_v38 }
 0x3b5   :  { %v1229_v20 = vmax.f32 %v1695_v44, 0.0 }
 0x3b6   :  { %v1222_v16 = vpop.f32.mrb[6].mxu0  ;;  %v1230_v48 = vmax.f32 %v1696_v18, 0.0 }
 0x3b7   :  { %v1697_v46 = vadd.f32 %v1222_v16, %v971_v36  ;;  %v1224_v47 = vpop.f32.mrb[7].mxu0  ;;  %v1239_v52 = vrot.slane %v1229_v20, 2 }
 0x3b8   :  { %v1698_v49 = vadd.f32 %v1224_v47, %v975_v38  ;;  %v1242_v54 = vrot.slane %v1230_v48, 2 }
 0x3b9   :  { %v1231_v50 = vmax.f32 %v1697_v46, 0.0 }
 0x3ba   :  { %v1232_v51 = vmax.f32 %v1698_v49, 0.0 }
 0x3bb   :  { %v1240_v53 = vrot.slane %v1231_v50, 2 }
 0x3bc   :  { %v1243_v21 = vrot.slane %v1232_v51, 2 }
 0x3bd   :  { %v1241_v7 = vsel %vm200_vm3, %v1239_v52, %v1240_v53 }
 0x3be   :  { %1247 = vst [vmem:[%s3045_s6 + $0x10] sm:$0xff] %v1241_v7  ;;  %v1244_v55 = vsel %vm200_vm3, %v1242_v54, %v1243_v21 }
 0x3bf   :  { %1248 = vst [vmem:[%s3045_s6 + $0x18] sm:$0xff] %v1244_v55 }

</bundles_post_ra>
